<compile_context>
chip_gen: v7x
topology: tpu7x:2x2x1
jax: 0.10.0
libtpu: 0.0.40
codegen_flags: <defaults>
</compile_context>

<pallas_src>
import functools

import jax
import jax.numpy as jnp
from jax.experimental import pallas as pl
from jax.experimental.pallas import tpu as pltpu


FEAT_PAD = 1024   # fc interface dim, padded 1000 -> 1024 (inert zero padding)
NCLS_PAD = 128    # fc2 output lanes, padded num_classes -> 128
HEAD_TN = 256     # per-grid-step N-block of fc1 (= K-block of fc2)


# -----------------------------------------------------------------------------
# Single fused kernel, grid = (FEAT_PAD // HEAD_TN,):
#   step j == 0 : conv3x3 (one K=27 im2col matmul) + bias + ReLU
#                 -> global-avg-pool -> proj(1024) into f_ref;
#                 output accumulator initialised with fc2 bias.
#   every step  : h_j = ReLU(f @ W1[:, blk_j] + b1[blk_j])
#                 o  += h_j @ W2[blk_j, :]
# Blocking fc1's N axis streams/pipelines the dominant bf16 weight DMA.
# -----------------------------------------------------------------------------
def fused_cnn_kernel(x_ref, wc_ref, bc_ref, wp_ref, bp_ref, w1_ref, b1_ref,
                     w2_ref, b2_ref, o_ref, f_ref):
    # x_ref  : (B*H*W, 9*Cin)   f32   im2col patch slab (built in the wrapper)
    # wc_ref : (9*Cin, Cout)    f32   conv weight, (ky, kx, cin)-major rows
    # bc_ref : (1, Cout)        f32
    # wp_ref : (Cout, F)        bf16  backbone -> 1024-dim projection
    # bp_ref : (1, F)           f32
    # w1_ref : (F, HEAD_TN)     bf16  fc1 N-block for this grid step
    # b1_ref : (1, HEAD_TN)     f32
    # w2_ref : (HEAD_TN, 128)   bf16  fc2 K-block for this grid step
    # b2_ref : (1, 128)         f32
    # o_ref  : (B, 128)         f32   padded logits, resident accumulator
    # f_ref  : (B, F)           f32   VMEM scratch, interface features
    j = pl.program_id(0)

    @pl.when(j == 0)
    def _():
        B = f_ref.shape[0]
        bhw = x_ref.shape[0]
        cout = wc_ref.shape[1]
        # ---- conv3x3 as ONE lane-dense im2col contraction (K = 9*Cin) -------
        feat = jnp.dot(x_ref[...], wc_ref[...],
                       preferred_element_type=jnp.float32)       # (BHW, Cout)
        feat = jnp.maximum(feat + bc_ref[0, :], 0.0)
        # ---- global average pool (never leaves registers/VMEM) --------------
        hw = bhw // B
        pooled = jnp.sum(feat.reshape(B, hw, cout), axis=1) * (1.0 / hw)
        # ---- backbone -> 1024-dim interface features (f32 compute) ----------
        f_ref[...] = (jnp.dot(pooled, wp_ref[...].astype(jnp.float32),
                              preferred_element_type=jnp.float32)
                      + bp_ref[0, :])
        # ---- fold fc2 bias into the output accumulator -----------------------
        o_ref[...] = jnp.zeros_like(o_ref) + b2_ref[0, :]

    # ---- blocked head: fc1 N-block -> ReLU -> fc2 K-block accumulation ------
    h = jnp.dot(f_ref[...], w1_ref[...].astype(jnp.float32),
                preferred_element_type=jnp.float32) + b1_ref[0, :]
    h = jnp.maximum(h, 0.0)
    o_ref[...] += jnp.dot(h, w2_ref[...].astype(jnp.float32),
                          preferred_element_type=jnp.float32)


def fused_cnn(x_nhwc, params, num_classes):
    B, H, W, Cin = x_nhwc.shape
    wc = params["w_conv"]
    KH, KW, _, Cout = wc.shape

    # Wrapper-side im2col: lane-contiguous (B*H*W, KH*KW*Cin) slab, rows ordered
    # (ky, kx, cin)-major to match w_conv.reshape(KH*KW*Cin, Cout).
    xpad = jnp.pad(x_nhwc, ((0, 0), (1, 1), (1, 1), (0, 0)))
    taps = [xpad[:, ky:ky + H, kx:kx + W, :]
            for ky in range(KH) for kx in range(KW)]
    slab = jnp.concatenate(taps, axis=-1).reshape(B * H * W, KH * KW * Cin)
    wc2d = wc.reshape(KH * KW * Cin, Cout)

    F = params["w_fc1"].shape[0]          # FEAT_PAD
    n_blocks = F // HEAD_TN

    # TODO(synk): on v7x (2 TensorCores) the head-N axis could be split across
    # cores, but o_ref is a reduction accumulator over this axis, so that needs
    # per-core partial outputs + a cross-core reduce; kept "arbitrary" here.
    # TODO(synk): for v5e/v6e an int8 (fp8 on v7x) w_fc1/w_fc2 path would halve
    # the dominant weight DMA; kept bf16 for numerics.
    out_pad = pl.pallas_call(
        fused_cnn_kernel,
        out_shape=jax.ShapeDtypeStruct((B, NCLS_PAD), jnp.float32),
        grid=(n_blocks,),
        in_specs=[
            pl.BlockSpec((B * H * W, KH * KW * Cin), lambda j: (0, 0)),
            pl.BlockSpec((KH * KW * Cin, Cout), lambda j: (0, 0)),
            pl.BlockSpec((1, Cout), lambda j: (0, 0)),
            pl.BlockSpec((Cout, F), lambda j: (0, 0)),
            pl.BlockSpec((1, F), lambda j: (0, 0)),
            pl.BlockSpec((F, HEAD_TN), lambda j: (0, j)),       # fc1 N-block
            pl.BlockSpec((1, HEAD_TN), lambda j: (0, j)),
            pl.BlockSpec((HEAD_TN, NCLS_PAD), lambda j: (j, 0)),  # fc2 K-block
            pl.BlockSpec((1, NCLS_PAD), lambda j: (0, 0)),
        ],
        out_specs=pl.BlockSpec((B, NCLS_PAD), lambda j: (0, 0)),
        scratch_shapes=[
            pltpu.VMEM((B, F), jnp.float32),        # interface features f
        ],
        compiler_params=pltpu.CompilerParams(
            dimension_semantics=("arbitrary",),      # reduction into o_ref
            vmem_limit_bytes=32 * 1024 * 1024),      # ~3 MiB resident; headroom
    )(slab, wc2d, params["b_conv"], params["w_proj"], params["b_proj"],
      params["w_fc1"], params["b_fc1"], params["w_fc2"], params["b_fc2"])
    return out_pad[:, :num_classes]


# -----------------------------------------------------------------------------
# Full forward (CNN.forward equivalent)
# -----------------------------------------------------------------------------
@functools.partial(jax.jit, static_argnames=("num_classes",))
def cnn_forward(x_nchw, params, num_classes):
    x_nhwc = jnp.transpose(x_nchw, (0, 2, 3, 1))                # NCHW -> NHWC
    return fused_cnn(x_nhwc, params, num_classes)


def init_params(key, cin=3, cconv=32, feat_dim=1000, num_classes=10):
    assert num_classes <= NCLS_PAD and feat_dim <= FEAT_PAD
    ks = jax.random.split(key, 8)
    s = 0.02

    def pad2(a, rows, cols):
        out = jnp.zeros((rows, cols), jnp.float32)
        return out.at[:a.shape[0], :a.shape[1]].set(a)

    w_proj = s * jax.random.normal(ks[2], (cconv, feat_dim), jnp.float32)
    b_proj = s * jax.random.normal(ks[3], (1, feat_dim), jnp.float32)
    w_fc1 = s * jax.random.normal(ks[4], (feat_dim, feat_dim), jnp.float32)
    b_fc1 = s * jax.random.normal(ks[5], (1, feat_dim), jnp.float32)
    w_fc2 = s * jax.random.normal(ks[6], (feat_dim, num_classes), jnp.float32)
    b_fc2 = s * jax.random.normal(ks[7], (1, num_classes), jnp.float32)
    return {
        "w_conv": s * jax.random.normal(ks[0], (3, 3, cin, cconv), jnp.float32),
        "b_conv": s * jax.random.normal(ks[1], (1, cconv), jnp.float32),
        # Head weights stored bf16 (weight-bandwidth bound at B=2); all fc dims
        # zero-padded 1000->1024 / num_classes->128 so every head GEMM and the
        # output store are lane/sublane dense.  Padding is inert (zeros).
        "w_proj": pad2(w_proj, cconv, FEAT_PAD).astype(jnp.bfloat16),
        "b_proj": pad2(b_proj, 1, FEAT_PAD),
        "w_fc1": pad2(w_fc1, FEAT_PAD, FEAT_PAD).astype(jnp.bfloat16),
        "b_fc1": pad2(b_fc1, 1, FEAT_PAD),
        "w_fc2": pad2(w_fc2, FEAT_PAD, NCLS_PAD).astype(jnp.bfloat16),
        "b_fc2": pad2(b_fc2, 1, NCLS_PAD),
    }


def reference_forward(x_nchw, p, num_classes):
    """Pure-JAX reference for a correctness sanity check."""
    x = jnp.transpose(x_nchw, (0, 2, 3, 1))
    feat = jax.lax.conv_general_dilated(
        x, p["w_conv"], window_strides=(1, 1), padding="SAME",
        dimension_numbers=("NHWC", "HWIO", "NHWC"),
        precision=jax.lax.Precision.HIGHEST)
    feat = jnp.maximum(feat + p["b_conv"][0], 0.0)
    pooled = jnp.mean(feat, axis=(1, 2))
    f = pooled @ p["w_proj"].astype(jnp.float32) + p["b_proj"][0]
    h = jnp.maximum(f @ p["w_fc1"].astype(jnp.float32) + p["b_fc1"][0], 0.0)
    out = h @ p["w_fc2"].astype(jnp.float32) + p["b_fc2"][0]
    return out[:, :num_classes]


if __name__ == "__main__":
    key = jax.random.PRNGKey(0)
    k_x, k_p = jax.random.split(key)

    B, C, H, W = 2, 3, 16, 16
    num_classes = 10
    x = jax.random.normal(k_x, (B, C, H, W), dtype=jnp.float32)   # NCHW input
    params = init_params(k_p, cin=C, cconv=32, feat_dim=1000,
                         num_classes=num_classes)

    out = cnn_forward(x, params, num_classes=num_classes)
    out = jax.block_until_ready(out)

    ref = jax.block_until_ready(reference_forward(x, params, num_classes))
    assert out.shape == (B, num_classes)
    assert jnp.allclose(out, ref, atol=1e-3, rtol=1e-3)

    print("KERNEL_OK")
</pallas_src>

<mosaic_0001>
module attributes {stable_mosaic.version = 11 : i64} {
  func.func @fused_cnn_kernel(%arg0: i32, %arg1: memref<512x27xf32, #tpu.memory_space<vmem>>, %arg2: memref<27x32xf32, #tpu.memory_space<vmem>>, %arg3: memref<1x32xf32, #tpu.memory_space<vmem>>, %arg4: memref<32x1024xbf16, #tpu.memory_space<vmem>>, %arg5: memref<1x1024xf32, #tpu.memory_space<vmem>>, %arg6: memref<1024x256xbf16, #tpu.memory_space<vmem>>, %arg7: memref<1x256xf32, #tpu.memory_space<vmem>>, %arg8: memref<256x128xbf16, #tpu.memory_space<vmem>>, %arg9: memref<1x128xf32, #tpu.memory_space<vmem>>, %arg10: memref<2x128xf32, #tpu.memory_space<vmem>>, %arg11: memref<2x1024xf32, #tpu.memory_space<vmem>>) attributes {dimension_semantics = [#tpu.dimension_semantics<arbitrary>], iteration_bounds = array<i64: 4>, scalar_prefetch = 0 : i64, scratch_operands = 1 : i64, tpu.core_type = #tpu.core_type<tc>, window_params = [{pipeline_mode = #tpu.pipeline_mode<synchronous>, transform_indices = @transform_0, window_bounds = array<i64: 512, 27>}, {pipeline_mode = #tpu.pipeline_mode<synchronous>, transform_indices = @transform_1, window_bounds = array<i64: 27, 32>}, {pipeline_mode = #tpu.pipeline_mode<synchronous>, transform_indices = @transform_2, window_bounds = array<i64: 1, 32>}, {pipeline_mode = #tpu.pipeline_mode<synchronous>, transform_indices = @transform_3, window_bounds = array<i64: 32, 1024>}, {pipeline_mode = #tpu.pipeline_mode<synchronous>, transform_indices = @transform_4, window_bounds = array<i64: 1, 1024>}, {transform_indices = @transform_5, window_bounds = array<i64: 1024, 256>}, {transform_indices = @transform_6, window_bounds = array<i64: 1, 256>}, {transform_indices = @transform_7, window_bounds = array<i64: 256, 128>}, {pipeline_mode = #tpu.pipeline_mode<synchronous>, transform_indices = @transform_8, window_bounds = array<i64: 1, 128>}, {pipeline_mode = #tpu.pipeline_mode<synchronous>, transform_indices = @transform_9, window_bounds = array<i64: 2, 128>}]} {
    %c0_i32 = arith.constant 0 : i32
    %0 = arith.cmpi eq, %arg0, %c0_i32 : i32
    %1 = arith.extui %0 : i1 to i32
    %c0_i32_0 = arith.constant 0 : i32
    %2 = arith.cmpi ne, %1, %c0_i32_0 : i32
    scf.if %2 {
      %c0_14 = arith.constant 0 : index
      %c0_15 = arith.constant 0 : index
      %20 = vector.load %arg1[%c0_14, %c0_15] : memref<512x27xf32, #tpu.memory_space<vmem>>, vector<512x27xf32>
      %c0_16 = arith.constant 0 : index
      %c0_17 = arith.constant 0 : index
      %21 = vector.load %arg2[%c0_16, %c0_17] : memref<27x32xf32, #tpu.memory_space<vmem>>, vector<27x32xf32>
      %cst_18 = arith.constant dense<0.000000e+00> : vector<512x32xf32>
      %22 = tpu.matmul %20, %21, %cst_18 {dimension_numbers = #tpu.dot_dimension_numbers<[1], [0], [0], [1], [0, 0, 1, 1], [], []>} : vector<512x27xf32>, vector<27x32xf32>, vector<512x32xf32> -> vector<512x32xf32>
      %c0_19 = arith.constant 0 : index
      %c0_20 = arith.constant 0 : index
      %23 = vector.load %arg3[%c0_19, %c0_20] : memref<1x32xf32, #tpu.memory_space<vmem>>, vector<1x32xf32>
      %24 = vector.shape_cast %23 : vector<1x32xf32> to vector<32xf32>
      %25 = vector.shape_cast %24 : vector<32xf32> to vector<1x32xf32>
      %26 = vector.broadcast %25 : vector<1x32xf32> to vector<512x32xf32>
      %27 = arith.addf %22, %26 : vector<512x32xf32>
      %cst_21 = arith.constant 0.000000e+00 : f32
      %28 = vector.broadcast %cst_21 : f32 to vector<512x32xf32>
      %29 = arith.maximumf %27, %28 : vector<512x32xf32>
      %30 = vector.shape_cast %29 : vector<512x32xf32> to vector<2x256x32xf32>
      %cst_22 = arith.constant dense<0.000000e+00> : vector<2x32xf32>
      %31 = vector.multi_reduction <add>, %30, %cst_22 [1] : vector<2x256x32xf32> to vector<2x32xf32>
      %cst_23 = arith.constant 3.906250e-03 : f32
      %32 = vector.broadcast %cst_23 : f32 to vector<2x32xf32>
      %33 = arith.mulf %31, %32 : vector<2x32xf32>
      %c0_24 = arith.constant 0 : index
      %c0_25 = arith.constant 0 : index
      %34 = vector.load %arg4[%c0_24, %c0_25] : memref<32x1024xbf16, #tpu.memory_space<vmem>>, vector<32x1024xbf16>
      %35 = arith.extf %34 : vector<32x1024xbf16> to vector<32x1024xf32>
      %cst_26 = arith.constant dense<0.000000e+00> : vector<2x1024xf32>
      %36 = tpu.matmul %33, %35, %cst_26 {dimension_numbers = #tpu.dot_dimension_numbers<[1], [0], [0], [1], [0, 0, 1, 1], [], []>} : vector<2x32xf32>, vector<32x1024xf32>, vector<2x1024xf32> -> vector<2x1024xf32>
      %c0_27 = arith.constant 0 : index
      %c0_28 = arith.constant 0 : index
      %37 = vector.load %arg5[%c0_27, %c0_28] : memref<1x1024xf32, #tpu.memory_space<vmem>>, vector<1x1024xf32>
      %38 = vector.shape_cast %37 : vector<1x1024xf32> to vector<1024xf32>
      %39 = vector.shape_cast %38 : vector<1024xf32> to vector<1x1024xf32>
      %40 = vector.broadcast %39 : vector<1x1024xf32> to vector<2x1024xf32>
      %41 = arith.addf %36, %40 : vector<2x1024xf32>
      %c0_29 = arith.constant 0 : index
      %c0_30 = arith.constant 0 : index
      %42 = vector.load %arg11[%c0_29, %c0_30] : memref<2x1024xf32, #tpu.memory_space<vmem>>, vector<2x1024xf32>
      tpu.vector_store %arg11[%c0_29, %c0_30], %41 {strides = array<i32>} : memref<2x1024xf32, #tpu.memory_space<vmem>>, vector<2x1024xf32>,
      %cst_31 = arith.constant 0.000000e+00 : f32
      %43 = vector.broadcast %cst_31 : f32 to vector<2x128xf32>
      %c0_32 = arith.constant 0 : index
      %c0_33 = arith.constant 0 : index
      %44 = vector.load %arg9[%c0_32, %c0_33] : memref<1x128xf32, #tpu.memory_space<vmem>>, vector<1x128xf32>
      %45 = vector.shape_cast %44 : vector<1x128xf32> to vector<128xf32>
      %46 = vector.shape_cast %45 : vector<128xf32> to vector<1x128xf32>
      %47 = vector.broadcast %46 : vector<1x128xf32> to vector<2x128xf32>
      %48 = arith.addf %43, %47 : vector<2x128xf32>
      %c0_34 = arith.constant 0 : index
      %c0_35 = arith.constant 0 : index
      %49 = vector.load %arg10[%c0_34, %c0_35] : memref<2x128xf32, #tpu.memory_space<vmem>>, vector<2x128xf32>
      tpu.vector_store %arg10[%c0_34, %c0_35], %48 {strides = array<i32>} : memref<2x128xf32, #tpu.memory_space<vmem>>, vector<2x128xf32>,
    } else {
    }
    %c0 = arith.constant 0 : index
    %c0_1 = arith.constant 0 : index
    %3 = vector.load %arg11[%c0, %c0_1] : memref<2x1024xf32, #tpu.memory_space<vmem>>, vector<2x1024xf32>
    %c0_2 = arith.constant 0 : index
    %c0_3 = arith.constant 0 : index
    %4 = vector.load %arg6[%c0_2, %c0_3] : memref<1024x256xbf16, #tpu.memory_space<vmem>>, vector<1024x256xbf16>
    %5 = arith.extf %4 : vector<1024x256xbf16> to vector<1024x256xf32>
    %cst = arith.constant dense<0.000000e+00> : vector<2x256xf32>
    %6 = tpu.matmul %3, %5, %cst {dimension_numbers = #tpu.dot_dimension_numbers<[1], [0], [0], [1], [0, 0, 1, 1], [], []>} : vector<2x1024xf32>, vector<1024x256xf32>, vector<2x256xf32> -> vector<2x256xf32>
    %c0_4 = arith.constant 0 : index
    %c0_5 = arith.constant 0 : index
    %7 = vector.load %arg7[%c0_4, %c0_5] : memref<1x256xf32, #tpu.memory_space<vmem>>, vector<1x256xf32>
    %8 = vector.shape_cast %7 : vector<1x256xf32> to vector<256xf32>
    %9 = vector.shape_cast %8 : vector<256xf32> to vector<1x256xf32>
    %10 = vector.broadcast %9 : vector<1x256xf32> to vector<2x256xf32>
    %11 = arith.addf %6, %10 : vector<2x256xf32>
    %cst_6 = arith.constant 0.000000e+00 : f32
    %12 = vector.broadcast %cst_6 : f32 to vector<2x256xf32>
    %13 = arith.maximumf %11, %12 : vector<2x256xf32>
    %c0_7 = arith.constant 0 : index
    %c0_8 = arith.constant 0 : index
    %14 = vector.load %arg10[%c0_7, %c0_8] : memref<2x128xf32, #tpu.memory_space<vmem>>, vector<2x128xf32>
    %c0_9 = arith.constant 0 : index
    %c0_10 = arith.constant 0 : index
    %15 = vector.load %arg8[%c0_9, %c0_10] : memref<256x128xbf16, #tpu.memory_space<vmem>>, vector<256x128xbf16>
    %16 = arith.extf %15 : vector<256x128xbf16> to vector<256x128xf32>
    %cst_11 = arith.constant dense<0.000000e+00> : vector<2x128xf32>
    %17 = tpu.matmul %13, %16, %cst_11 {dimension_numbers = #tpu.dot_dimension_numbers<[1], [0], [0], [1], [0, 0, 1, 1], [], []>} : vector<2x256xf32>, vector<256x128xf32>, vector<2x128xf32> -> vector<2x128xf32>
    %18 = arith.addf %14, %17 : vector<2x128xf32>
    %c0_12 = arith.constant 0 : index
    %c0_13 = arith.constant 0 : index
    %19 = vector.load %arg10[%c0_12, %c0_13] : memref<2x128xf32, #tpu.memory_space<vmem>>, vector<2x128xf32>
    tpu.vector_store %arg10[%c0_12, %c0_13], %18 {strides = array<i32>} : memref<2x128xf32, #tpu.memory_space<vmem>>, vector<2x128xf32>,
    return
  }
  func.func @transform_0(%arg0: i32) -> (i32, i32) {
    %c0_i32 = arith.constant 0 : i32
    %c0_i32_0 = arith.constant 0 : i32
    %c0_i32_1 = arith.constant 0 : i32
    return %c0_i32, %c0_i32_0 : i32, i32
  }
  func.func @transform_1(%arg0: i32) -> (i32, i32) {
    %c0_i32 = arith.constant 0 : i32
    %c0_i32_0 = arith.constant 0 : i32
    %c0_i32_1 = arith.constant 0 : i32
    return %c0_i32, %c0_i32_0 : i32, i32
  }
  func.func @transform_2(%arg0: i32) -> (i32, i32) {
    %c0_i32 = arith.constant 0 : i32
    %c0_i32_0 = arith.constant 0 : i32
    %c0_i32_1 = arith.constant 0 : i32
    return %c0_i32, %c0_i32_0 : i32, i32
  }
  func.func @transform_3(%arg0: i32) -> (i32, i32) {
    %c0_i32 = arith.constant 0 : i32
    %c0_i32_0 = arith.constant 0 : i32
    %c0_i32_1 = arith.constant 0 : i32
    return %c0_i32, %c0_i32_0 : i32, i32
  }
  func.func @transform_4(%arg0: i32) -> (i32, i32) {
    %c0_i32 = arith.constant 0 : i32
    %c0_i32_0 = arith.constant 0 : i32
    %c0_i32_1 = arith.constant 0 : i32
    return %c0_i32, %c0_i32_0 : i32, i32
  }
  func.func @transform_5(%arg0: i32) -> (i32, i32) {
    %c0_i32 = arith.constant 0 : i32
    %c0_i32_0 = arith.constant 0 : i32
    return %c0_i32, %arg0 : i32, i32
  }
  func.func @transform_6(%arg0: i32) -> (i32, i32) {
    %c0_i32 = arith.constant 0 : i32
    %c0_i32_0 = arith.constant 0 : i32
    return %c0_i32, %arg0 : i32, i32
  }
  func.func @transform_7(%arg0: i32) -> (i32, i32) {
    %c0_i32 = arith.constant 0 : i32
    %c0_i32_0 = arith.constant 0 : i32
    return %arg0, %c0_i32 : i32, i32
  }
  func.func @transform_8(%arg0: i32) -> (i32, i32) {
    %c0_i32 = arith.constant 0 : i32
    %c0_i32_0 = arith.constant 0 : i32
    %c0_i32_1 = arith.constant 0 : i32
    return %c0_i32, %c0_i32_0 : i32, i32
  }
  func.func @transform_9(%arg0: i32) -> (i32, i32) {
    %c0_i32 = arith.constant 0 : i32
    %c0_i32_0 = arith.constant 0 : i32
    %c0_i32_1 = arith.constant 0 : i32
    return %c0_i32, %c0_i32_0 : i32, i32
  }
}

</mosaic_0001>

<bundles_post_ra>
// kernel: cnn_forward.1
= control target key start
LH: loop header
LB: loop body
LE: loop exit
PB: predicated region body
PF: predicated region fallthrough
CT: control target
= control target key end

     0   :  { %s5279_s0 = inlined_call_operand.vmem [shape: f32[512,27], index: 0, kind: input, shape index: {}]   ;;  %s5280_s1 = inlined_call_operand.vmem [shape: f32[27,32], index: 1, kind: input, shape index: {}]   ;;  %s5281_s2 = inlined_call_operand.hbm [shape: f32[1,32], index: 2, kind: input, shape index: {}]   ;;  %s5282_s3 = inlined_call_operand.hbm [shape: bf16[32,1024], index: 3, kind: input, shape index: {}]   ;;  %s5283_s4 = inlined_call_operand.hbm [shape: f32[1,1024], index: 4, kind: input, shape index: {}]   ;;  %s5284_s5 = inlined_call_operand.hbm [shape: bf16[1024,1024], index: 5, kind: input, shape index: {}]   ;;  %s5285_s6 = inlined_call_operand.hbm [shape: f32[1,1024], index: 6, kind: input, shape index: {}]   ;;  %s5286_s7 = inlined_call_operand.hbm [shape: bf16[1024,128], index: 7, kind: input, shape index: {}]   ;;  %s5287_s8 = inlined_call_operand.hbm [shape: f32[1,128], index: 8, kind: input, shape index: {}]   ;;  %s5288_s9 = inlined_call_operand.hbm [shape: f32[2,128], index: 9, kind: output, shape index: {}]  }
   0x1   :  { %5308 = sst [smem:[#allocation25_spill]] %s5279_s0 }
   0x2   :  { %5309 = sst [smem:[#allocation26_spill]] %s5280_s1 }
   0x3   :  { %5310 = sst [smem:[#allocation27_spill]] %s5282_s3 }
   0x4   :  { %5311 = sst [smem:[#allocation28_spill]] %s5284_s5 }
   0x5   :  { %5312 = sst [smem:[#allocation29_spill]] %s5287_s8 }
   0x6   :  { %5313 = sst [smem:[#allocation30_spill]] %s5288_s9 }
   0x7   :  { %14 = vsyncpa [#allocation4], 0 }
   0x8   :  { %15 = vsyncpa [#allocation7], 0 }
   0x9   :  { %16 = vsyncpa [#allocation10], 0 }
   0xa   :  { %18 = vsyncpa [#allocation10 + $0x1], 0 }
   0xb   :  { %19 = vsyncpa [#allocation13], 0 }
   0xc   :  { %21 = vsyncpa [#allocation13 + $0x1], 0 }
   0xd   :  { %22 = vsyncpa [#allocation5], 0  ;;  %s4303_s30 = smov 0   ;;  %s4305_s10 = smov 0  }
   0xe   :  { %s4307_s11 = smov 0   ;;  %s4309_s12 = smov 0  }
   0xf LB: > { %5314 = sst [smem:[#allocation22_spill]] %s4229_s11  ;;  %s4322_s13 = sadd.s32 4294967295, %s4233_s12   ;;  %s4233_s12 = sphi %s4309_s12, %s5344_s12   ;;  %s4229_s11 = sphi %s4307_s11, %s5346_s11   ;;  %s4225_s10 = sphi %s4305_s10, %s5348_s10   ;;  %s4221_s30 = sphi %s4303_s30, %s5347_s30  }
  0x10   : > { %p153_p0 = scmp.ne.s32.totalorder %s4225_s10, %s4221_s30  ;;  %p5289_p1 = scmp.eq.s32.totalorder %s4322_s13, 0 }
  0x11   : > { %p2776_p2 = scmp.ge.s32.totalorder %s4233_s12, 1  ;;  %p258_p3 = scmp.lt.s32.totalorder %s4233_s12, 5 }
  0x12   : > { %p4331_p5 = por %p5289_p1, %p153_p0  ;;  %s4235_s16 = smov [#allocation6]  }
  0x13   : > { %p4335_p6 = pnand %p2776_p2, %p258_p3  ;;  %s287_s17 = sshll.u32 %s4235_s16, 4  ;;  %s288_s17 = int_to_ptr.vmem [resolvable:$true] %s287_s17 }
  0x14   : > { %s5315_s14 = scalar_select %p4331_p5, 1, 0 }
  0x15   : > { %s5316_s15 = scalar_select %p4335_p6, 1, 0 }
  0x16   : > { %p3676_p7 = pneg %p4335_p6  ;;  %s4236_s19 = smov [#allocation14]  }
  0x17   : > { %s312_s20 = sshll.u32 %s4236_s19, 4  ;;  %s5318_s3 = sld [smem:[#allocation27_spill]]  ;;  %s4347_s20 = int_to_ptr.vmem [resolvable:$true] %s312_s20 }
  0x18   : > { %p4343_p8 = pnand %p3676_p7, %p5289_p1 }
  0x1a   : > { %s5317_s18 = scalar_select %p4343_p8, 1, 0 }
  0x1b   : > { %p4357_p10 = pneg %p4343_p8 }
  0x1d   : > { %s3951_s23 = scalar_lea.hbm %s5318_s3, 2048 }
  0x1e   : > { %p3952_p9 = scmp.ne.s32.totalorder %s5318_s3, %s3951_s23  ;;  %p3958_p13 = scmp.lt.u32.totalorder %s3951_s23, %s5318_s3 }
  0x1f   : > { %s5319_s26 = scalar_select %p4357_p10, 1, 0 }
  0x20   : > { %p3954_p11 = pnand %p4357_p10, %p3952_p9 }
  0x22   : > { %p3955_p12 = pneg %p3954_p11 }
  0x24   : > { %p3960_p0 = pnand %p3958_p13, %p3955_p12 }
  0x26   : > { %3963 = shalt.err (!%p3960_p0)
}
  0x27   : > { %s3964_s29 = scalar_lea.vmem %s288_s17, 2048  ;;  %p3972_p4 = scmp.lt.s32.totalorder %s288_s17, %s288_s17 }
  0x28   : > { %p3965_p2 = scmp.ne.s32.totalorder %s288_s17, %s3964_s29  ;;  %p3973_p1 = scmp.lt.s32.totalorder %s3964_s29, %s3964_s29 }
  0x2a   : > { %p3967_p3 = pnand %p3965_p2, %p4357_p10  ;;  %p3974_p5 = por %p3973_p1, %p3972_p4 }
  0x2c   : > { %p3968_p7 = pneg %p3967_p3 }
  0x2e   : > { %p3975_p6 = pnand %p3974_p5, %p3968_p7 }
  0x30   : > { %3978 = shalt.err (!%p3975_p6)
}
  0x31   : > { %s5292_s30 = smov 512   ;;  %s4238_s16 = smov 32  }
  0x32   : > { %3682 = dma.hbm_to_vmem [thread:$0]  (!%p4343_p8), %s5318_s3, 2048, %s288_s17, [#allocation7], %s5292_s30, %s5292_s30, %s4238_s16  }
  0x33   : > { %s5320_s8 = sld [smem:[#allocation29_spill]] }
  0x39   : > { %s3979_s24 = scalar_lea.hbm %s5320_s8, 16 }
  0x3a   : > { %p3980_p1 = scmp.ne.s32.totalorder %s5320_s8, %s3979_s24  ;;  %p3986_p6 = scmp.lt.u32.totalorder %s3979_s24, %s5320_s8 }
  0x3c   : > { %p3982_p4 = pnand %p3980_p1, %p4357_p10 }
  0x3e   : > { %p3983_p5 = pneg %p3982_p4 }
  0x40   : > { %p3988_p9 = pnand %p3986_p6, %p3983_p5 }
  0x42   : > { %3991 = shalt.err (!%p3988_p9)
}
  0x43   : > { %s3992_s17 = scalar_lea.vmem %s4347_s20, 16  ;;  %s3999_s16 = scalar_lea.vmem %s4347_s20, 32 }
  0x44   : > { %p3993_p11 = scmp.ne.s32.totalorder %s4347_s20, %s3992_s17  ;;  %p4000_p0 = scmp.lt.s32.totalorder %s4347_s20, %s4347_s20 }
  0x45   : > { %p4001_p2 = scmp.lt.s32.totalorder %s3999_s16, %s3992_s17 }
  0x46   : > { %p3995_p12 = pnand %p3993_p11, %p4357_p10 }
  0x47   : > { %p4002_p3 = por %p4001_p2, %p4000_p0 }
  0x48   : > { %p3996_p13 = pneg %p3995_p12 }
  0x4a   : > { %p4003_p7 = pnand %p4002_p3, %p3996_p13 }
  0x4c   : > { %4006 = shalt.err (!%p4003_p7)
}
  0x4d   : > { %3688 = dma.hbm_to_vmem [thread:$0]  (!%p4343_p8), %s5320_s8, 16, %s4347_s20, [#allocation13]  }
  0x4e   : > { %s4400_s22 = sadd.s32 1, %s4233_s12   ;;  %s140_s23 = sadd.s32 1, %s4229_s11 }
  0x4f   : > { %5321 = sst [smem:[#allocation23_spill]] %s4400_s22  ;;  %s137_s24 = ssub.s32 %s4233_s12, %s4400_s22 }
  0x50   : > { %p147_p1 = scmp.ne.s32.totalorder %s4229_s11, %s4225_s10  ;;  %p138_p4 = scmp.eq.s32.totalorder %s137_s24, 0 }
  0x51   : > { %p148_p5 = scmp.eq.s32.totalorder %s4233_s12, 0  ;;  %p3703_p6 = scmp.lt.s32.totalorder %s4233_s12, 4 }
  0x52   : > { %s5293_s25 = sand.u32 1, %s4233_s12   ;;  %s4414_s28 = sand.u32 1, %s4229_s11  }
  0x53   : > { %s4411_s27 = scalar_select %p138_p4, %s4229_s11, %s140_s23  }
  0x54   : > { %p149_p9 = por %p148_p5, %p147_p1  ;;  %s2875_s29 = sshll.u32 %s4233_s12, 7 }
  0x55   : > { %5322 = sst [smem:[#allocation24_spill]] %s4411_s27  ;;  %s2782_s17 = sshll.u32 %s4414_s28, 10 }
  0x56   : > { %s5323_s5 = sld [smem:[#allocation28_spill]]  ;;  %p4423_p11 = pnand %p3703_p6, %p149_p9 }
  0x57   : > { %s327_s23 = scalar_lea.vmem [#allocation9], %s2782_s17  ;;  %s4431_s30 = scalar_lea.sflag [#allocation10], %s5293_s25 }
  0x58   : > { %s5324_s21 = scalar_select %p4423_p11, 1, 0 }
  0x59   : > { %s334_s24 = sshll.u32 %s327_s23, 4  ;;  %p4437_p13 = pneg %p4423_p11  ;;  %s4427_s24 = int_to_ptr.vmem [resolvable:$true] %s334_s24 }
  0x5c   : > { %s4421_s19 = scalar_lea.hbm %s5323_s5, %s2875_s29  ;;  %s4012_s17 = scalar_lea.hbm %s5323_s5, 65536 }
  0x5d   : > { %s4007_s3 = scalar_lea.hbm %s4421_s19, 16384  ;;  %p4013_p3 = scmp.lt.u32.totalorder %s4421_s19, %s5323_s5 }
  0x5e   : > { %p4008_p12 = scmp.ne.s32.totalorder %s4421_s19, %s4007_s3  ;;  %p4014_p7 = scmp.lt.u32.totalorder %s4012_s17, %s4007_s3 }
  0x5f   : > { %s5325_s29 = scalar_select %p4437_p13, 1, 0 }
  0x60   : > { %p4010_p0 = pnand %p4437_p13, %p4008_p12  ;;  %p4015_p1 = por %p4014_p7, %p4013_p3 }
  0x61   : > { %p4016_p4 = scmp.lt.u32.totalorder %s4007_s3, %s4421_s19 }
  0x62   : > { %p4011_p2 = pneg %p4010_p0 }
  0x63   : > { %p4017_p5 = por %p4016_p4, %p4015_p1 }
  0x65   : > { %p4018_p6 = pnand %p4017_p5, %p4011_p2 }
  0x67   : > { %4021 = shalt.err (!%p4018_p6)
}
  0x68   : > { %s4022_s25 = scalar_lea.vmem %s4427_s24, 16384  ;;  %s4239_s20 = smov [#allocation9]  }
  0x69   : > { %p4023_p9 = scmp.ne.s32.totalorder %s4427_s24, %s4022_s25  ;;  %s4027_s16 = sshll.u32 %s4239_s20, 4  ;;  %s4028_s16 = int_to_ptr.vmem [resolvable:$false] %s4027_s16 }
  0x6a   : > { %s4029_s8 = scalar_lea.vmem %s4028_s16, 32768  ;;  %p4030_p8 = scmp.lt.s32.totalorder %s4427_s24, %s4028_s16 }
  0x6b   : > { %p4025_p12 = pnand %p4023_p9, %p4437_p13  ;;  %p4031_p10 = scmp.lt.s32.totalorder %s4029_s8, %s4022_s25 }
  0x6d   : > { %p4026_p0 = pneg %p4025_p12  ;;  %p4032_p3 = por %p4031_p10, %p4030_p8 }
  0x6f   : > { %p4033_p7 = pnand %p4032_p3, %p4026_p0 }
  0x71   : > { %4036 = shalt.err (!%p4033_p7)
}
  0x72   : > { %s4240_s3 = smov 128   ;;  %s4241_s17 = smov 8  }
  0x73   : > { %s5326_s23 = smov 512   ;;  %s4242_s5 = smov [#allocation3]  }
  0x74   : > { %3692 = dma.hbm_to_vmem [thread:$0]  (!%p4423_p11), %s4421_s19, 16384, %s4427_s24, %s4431_s30, %s5326_s23, %s4240_s3, %s4241_s17  }
  0x75   : > { %s277_s27 = sshll.u32 %s4242_s5, 4  ;;  %s4243_s20 = smov [#allocation8]   ;;  %s278_s27 = int_to_ptr.vmem [resolvable:$true] %s277_s27 }
  0x76   : > { %s301_s11 = sshll.u32 %s4243_s20, 4  ;;  %s4037_s8 = scalar_lea.hbm %s5281_s2, 16  ;;  %s302_s11 = int_to_ptr.vmem [resolvable:$true] %s301_s11 }
  0x77   : > { %p4038_p8 = scmp.ne.s32.totalorder %s5281_s2, %s4037_s8  ;;  %p5327_p10 = scmp.ne.s32.totalorder %s5319_s26, 0 }
  0x78   : > { %p4044_p4 = scmp.lt.u32.totalorder %s4037_s8, %s5281_s2 }
  0x79   : > { %p4040_p2 = pnand %p4038_p8, %p5327_p10 }
  0x7b   : > { %p4041_p1 = pneg %p4040_p2 }
  0x7d   : > { %p4046_p5 = pnand %p4044_p4, %p4041_p1 }
  0x7f   : > { %4049 = shalt.err (!%p4046_p5)
}
  0x80   : > { %s4050_s5 = scalar_lea.vmem %s278_s27, 16  ;;  %s4057_s19 = scalar_lea.vmem %s278_s27, 32 }
  0x81   : > { %p4051_p6 = scmp.ne.s32.totalorder %s278_s27, %s4050_s5  ;;  %p4058_p0 = scmp.lt.s32.totalorder %s278_s27, %s278_s27 }
  0x82   : > { %p4059_p3 = scmp.lt.s32.totalorder %s4057_s19, %s4050_s5 }
  0x83   : > { %p4053_p9 = pnand %p4051_p6, %p5327_p10 }
  0x84   : > { %p4060_p7 = por %p4059_p3, %p4058_p0 }
  0x85   : > { %p4054_p12 = pneg %p4053_p9 }
  0x87   : > { %p4061_p11 = pnand %p4060_p7, %p4054_p12 }
  0x89   : > { %4064 = shalt.err (!%p4061_p11)
}
  0x8a   : > { %p5328_p8 = scmp.ne.s32.totalorder %s5317_s18, 0  ;;  %s2785_s0 = sshll.u32 %s4414_s28, 1 }
  0x8b   : > { %s4065_s3 = scalar_lea.hbm %s5283_s4, 128 }
  0x8c   : > { %3679 = dma.hbm_to_vmem [thread:$0]  (!%p5328_p8), %s5281_s2, 16, %s278_s27, [#allocation4]  }
  0x8d   : > { %p4066_p2 = scmp.ne.s32.totalorder %s5283_s4, %s4065_s3  ;;  %p4072_p4 = scmp.lt.u32.totalorder %s4065_s3, %s5283_s4 }
  0x8f   : > { %p4068_p11 = pnand %p4066_p2, %p5327_p10 }
  0x91   : > { %p4069_p1 = pneg %p4068_p11 }
  0x93   : > { %p4074_p5 = pnand %p4072_p4, %p4069_p1 }
  0x95   : > { %4077 = shalt.err (!%p4074_p5)
}
  0x96   : > { %s4078_s27 = scalar_lea.vmem %s302_s11, 128  ;;  %p4086_p0 = scmp.lt.s32.totalorder %s302_s11, %s302_s11 }
  0x97   : > { %p4079_p6 = scmp.ne.s32.totalorder %s302_s11, %s4078_s27  ;;  %p4087_p3 = scmp.lt.s32.totalorder %s4078_s27, %s4078_s27 }
  0x99   : > { %p4081_p9 = pnand %p4079_p6, %p5327_p10  ;;  %p4088_p7 = por %p4087_p3, %p4086_p0 }
  0x9b   : > { %p4082_p12 = pneg %p4081_p9 }
  0x9d   : > { %p4089_p13 = pnand %p4088_p7, %p4082_p12 }
  0x9f   : > { %4092 = shalt.err (!%p4089_p13)
}
  0xa0   : > { %3685 = dma.hbm_to_vmem [thread:$0]  (!%p5328_p8), %s5283_s4, 128, %s302_s11, [#allocation7]  }
  0xa1   : > { %s2876_s5 = sshll.u32 %s4233_s12, 5  ;;  %s348_s22 = scalar_lea.vmem [#allocation11], %s2785_s0 }
  0xa2   : > { %s4503_s26 = scalar_lea.hbm %s5285_s6, %s2876_s5  ;;  %s356_s1 = sshll.u32 %s348_s22, 4  ;;  %s357_s1 = int_to_ptr.vmem [resolvable:$true] %s356_s1 }
  0xa3   : > { %s4093_s18 = scalar_lea.hbm %s4503_s26, 32  ;;  %p5329_p10 = scmp.ne.s32.totalorder %s5325_s29, 0 }
  0xa4   : > { %p4094_p13 = scmp.ne.s32.totalorder %s4503_s26, %s4093_s18  ;;  %s4098_s3 = scalar_lea.hbm %s5285_s6, 128 }
  0xa5   : > { %p4099_p8 = scmp.lt.u32.totalorder %s4503_s26, %s5285_s6  ;;  %p4100_p1 = scmp.lt.u32.totalorder %s4098_s3, %s4093_s18 }
  0xa6   : > { %p4096_p2 = pnand %p4094_p13, %p5329_p10  ;;  %p4102_p5 = scmp.lt.u32.totalorder %s4093_s18, %s4503_s26 }
  0xa7   : > { %p4101_p4 = por %p4100_p1, %p4099_p8 }
  0xa8   : > { %p4097_p11 = pneg %p4096_p2 }
  0xa9   : > { %p4103_p6 = por %p4102_p5, %p4101_p4 }
  0xab   : > { %p4104_p9 = pnand %p4103_p6, %p4097_p11 }
  0xad   : > { %4107 = shalt.err (!%p4104_p9)
}
  0xae   : > { %s4108_s0 = scalar_lea.vmem %s357_s1, 32  ;;  %s4244_s20 = smov [#allocation11]  }
  0xaf   : > { %p4109_p12 = scmp.ne.s32.totalorder %s357_s1, %s4108_s0  ;;  %s4113_s16 = sshll.u32 %s4244_s20, 4  ;;  %s4114_s16 = int_to_ptr.vmem [resolvable:$false] %s4113_s16 }
  0xb0   : > { %s4115_s27 = scalar_lea.vmem %s4114_s16, 64  ;;  %p4116_p7 = scmp.lt.s32.totalorder %s357_s1, %s4114_s16 }
  0xb1   : > { %p4111_p0 = pnand %p4109_p12, %p5329_p10  ;;  %p4117_p13 = scmp.lt.s32.totalorder %s4115_s27, %s4108_s0 }
  0xb3   : > { %p4112_p3 = pneg %p4111_p0  ;;  %p4118_p2 = por %p4117_p13, %p4116_p7 }
  0xb5   : > { %p4119_p1 = pnand %p4118_p2, %p4112_p3 }
  0xb7   : > { %4122 = shalt.err (!%p4119_p1)
}
  0xb8   : > { %p5330_p8 = scmp.ne.s32.totalorder %s5324_s21, 0  ;;  %s2788_s25 = sshll.u32 %s4414_s28, 7 }
  0xb9   : > { %s2877_s8 = sshll.u32 %s4233_s12, 11  ;;  %s367_s22 = scalar_lea.vmem [#allocation12], %s2788_s25 }
  0xba   : > { %3695 = dma.hbm_to_vmem [thread:$0]  (!%p5330_p8), %s4503_s26, 32, %s357_s1, %s4431_s30  }
  0xbb   : > { %s4528_s9 = scalar_lea.hbm %s5286_s7, %s2877_s8  ;;  %s374_s18 = sshll.u32 %s367_s22, 4  ;;  %s4530_s18 = int_to_ptr.vmem [resolvable:$true] %s374_s18 }
  0xbc   : > { %s5331_s24 = sand.u32 1, %s4233_s12   ;;  %s4123_s3 = scalar_lea.hbm %s4528_s9, 2048 }
  0xbd   : > { %s4534_s11 = scalar_lea.sflag [#allocation13], %s5331_s24  ;;  %p4124_p11 = scmp.ne.s32.totalorder %s4528_s9, %s4123_s3 }
  0xbe   : > { %s4128_s26 = scalar_lea.hbm %s5286_s7, 8192  ;;  %p4129_p6 = scmp.lt.u32.totalorder %s4528_s9, %s5286_s7 }
  0xbf   : > { %p4126_p4 = pnand %p4124_p11, %p5329_p10  ;;  %p4130_p9 = scmp.lt.u32.totalorder %s4128_s26, %s4123_s3 }
  0xc0   : > { %p4132_p0 = scmp.lt.u32.totalorder %s4123_s3, %s4528_s9 }
  0xc1   : > { %p4127_p5 = pneg %p4126_p4  ;;  %p4131_p12 = por %p4130_p9, %p4129_p6 }
  0xc3   : > { %p4133_p3 = por %p4132_p0, %p4131_p12 }
  0xc5   : > { %p4134_p7 = pnand %p4133_p3, %p4127_p5 }
  0xc7   : > { %4137 = shalt.err (!%p4134_p7)
}
  0xc8   : > { %s4138_s12 = scalar_lea.vmem %s4530_s18, 2048  ;;  %s4245_s23 = smov [#allocation12]  }
  0xc9   : > { %p4139_p13 = scmp.ne.s32.totalorder %s4530_s18, %s4138_s12  ;;  %s4143_s0 = sshll.u32 %s4245_s23, 4  ;;  %s4144_s0 = int_to_ptr.vmem [resolvable:$false] %s4143_s0 }
  0xca   : > { %s4145_s20 = scalar_lea.vmem %s4144_s0, 4096  ;;  %p4146_p11 = scmp.lt.s32.totalorder %s4530_s18, %s4144_s0 }
  0xcb   : > { %p4141_p2 = pnand %p4139_p13, %p5329_p10  ;;  %p4147_p4 = scmp.lt.s32.totalorder %s4145_s20, %s4138_s12 }
  0xcd   : > { %p4142_p1 = pneg %p4141_p2  ;;  %p4148_p6 = por %p4147_p4, %p4146_p11 }
  0xcf   : > { %p4149_p9 = pnand %p4148_p6, %p4142_p1 }
  0xd1   : > { %4152 = shalt.err (!%p4149_p9)
}
  0xd2   : > { %s4246_s16 = smov 64   ;;  %s4247_s27 = smov 4  }
  0xd3   : > { %3698 = dma.hbm_to_vmem [thread:$0]  (!%p5330_p8), %s4528_s9, 2048, %s4530_s18, %s4534_s11, %s4246_s16, %s4246_s16, %s4247_s27  }
  0xd4   : > { %p5332_p10 = scmp.ne.s32.totalorder %s5316_s15, 0 }
  0xd5   : > { %p5333_p5 = scmp.eq.s32.totalorder (!%p5332_p10), %s4322_s13, 0 }
  0xd6   : > { %386 = sbr.rel (%p5332_p10) target bundleno = 1449 (0x5a9), region = 56 }
  0xdd   : > { %4196 = dma.done.wait (%p5333_p5), [#allocation4], 16   ;;  %p5334_p12 = pmov %p5333_p5 }
  0xde   : > { %p5335_p0 = pmov %p5333_p5 }
  0xdf   : > { %4198 = vsyncadd (%p5334_p12), [#allocation4], 4294967280 }
  0xe0   : > { %4200 = dma.done.wait (%p5335_p0), [#allocation7], 2176   ;;  %p5336_p3 = pmov %p5335_p0 }
  0xe1   : > { %s400_s21 = sand.u32 1, %s4322_s13   ;;  %s402_s29 = sand.u32 1, %s4225_s10  }
  0xe2   : > { %4202 = vsyncadd (%p5336_p3), [#allocation7], 4294965120  ;;  %s2795_s25 = sshll.u32 %s402_s29, 10  ;;  %s401_s15 = scalar_lea.sflag [#allocation10], %s400_s21 }
  0xe3   : > { %s4570_s8 = scalar_lea.vmem [#allocation9], %s2795_s25  ;;  %p5337_p8 = scmp.ne.s32.totalorder %s5315_s14, 0 }
  0xe5   : > { %4204 = dma.done.wait (%p5337_p8), %s401_s15, 16416  }
  0xe6   : > { %4206 = vsyncadd (%p5337_p8), %s401_s15, 4294950880  ;;  %s2796_s5 = sshll.u32 %s402_s29, 1  ;;  %s2797_s19 = sshll.u32 %s402_s29, 7 }
  0xe7   : > { %s4576_s9 = scalar_lea.vmem [#allocation11], %s2796_s5  ;;  %s419_s22 = scalar_lea.sflag [#allocation13], %s400_s21 }
  0xe8   : > { %s4578_s18 = scalar_lea.vmem [#allocation12], %s2797_s19 }
  0xe9   : > { %4208 = dma.done.wait (%p5337_p8), %s419_s22, 2048  }
  0xea   : > { %4210 = vsyncadd (%p5337_p8), %s419_s22, 4294965248  ;;  %p5338_p7 = pmov %p5335_p0 }
  0xeb   : > { %p5339_p13 = pmov %p5335_p0 }
  0xec   : > { %4212 = dma.done.wait (%p5338_p7), [#allocation13], 16  }
  0xed   : > { %4214 = vsyncadd (%p5339_p13), [#allocation13], 4294967280  ;;  %p5340_p2 = scmp.ne.s32.totalorder %s4322_s13, 0 }
  0xee   : > { %s5341_s3 = sld [smem:[#allocation26_spill]] (!%p5340_p2)  ;;  %vm741_vm0 = vcmask (!%p5340_p2), 1042432   ;;  %vm548_vm1 = vcmask (!%p5340_p2), 220160   ;;  %s5342_s0 = sld [smem:[#allocation25_spill]] (!%p5340_p2)  ;;  %vm4248_vm2 = vmmov (!%p5340_p2), 1   ;;  %vm1194_vm4 = vcmask (!%p5340_p2), 261120  }
  0xef   : > { %472 = sbr.rel (%p5340_p2) target bundleno = 862 (0x35e), region = 88  ;;  %vm3169_vm3 = vmpackc.low (!%p5340_p2), %vm741_vm0, %vm4248_vm2  ;;  %vm1427_vm5 = vcmask (!%p5340_p2), 1041409  }
  0xf4   : > { %v537_v0 = vld [vmem:[%s5341_s3] sm:$0xff] (!%p5340_p2)  ;;  %v538_v1 = vld [vmem:[%s5341_s3 + $0x8] sm:$0xff] (!%p5340_p2)  ;;  %v539_v2 = vld [vmem:[%s5341_s3 + $0x10] sm:$0xff] (!%p5340_p2) }
  0xf5   : > { %v3164_v3 = vpack.c.bf16 (!%p5340_p2), %v538_v1, %v537_v0  ;;  %v540_v4 = vld [vmem:[%s5341_s3 + $0x18] sm:$0x7] (!%p5340_p2)  ;;  %v473_v5 = vld [vmem:[%s5342_s0] sm:$0xff] (!%p5340_p2)  ;;  %v474_v7 = vld [vmem:[%s5342_s0 + $0x8] sm:$0xff] (!%p5340_p2) }
  0xf6   : > { %v3168_v6 = vpack.c.bf16 %v540_v4, %v539_v2  ;;  %3068 = vmatprep.mubr.msk.f32.mxu0 %vm548_vm1, %v473_v5  ;;  %v475_v8 = vld [vmem:[%s5342_s0 + $0x10] sm:$0xff]  ;;  %v476_v9 = vld [vmem:[%s5342_s0 + $0x18] sm:$0xff]  ;;  %v477_v10 = vld [vmem:[%s5342_s0 + $0x20] sm:$0xff] }
  0xf7   : > { %3165 = vmatprep.subr.bf16.mxu0 %v3164_v3  ;;  %3494 = vmatprep.subr.bf16.mxu1 %v3164_v3  ;;  %v513_v11 = vld [vmem:[%s5342_s0 + $0x140] sm:$0xff]  ;;  %v514_v12 = vld [vmem:[%s5342_s0 + $0x148] sm:$0xff]  ;;  %v515_v13 = vld [vmem:[%s5342_s0 + $0x150] sm:$0xff] }
  0xf8   : > { %3167 = vmatpush3.bf16.msra.mxu0 %v3164_v3  ;;  %3496 = vmatpush3.bf16.msra.mxu1 %v3164_v3  ;;  %v478_v14 = vld [vmem:[%s5342_s0 + $0x28] sm:$0xff]  ;;  %v479_v15 = vld [vmem:[%s5342_s0 + $0x30] sm:$0xff]  ;;  %v516_v16 = vld [vmem:[%s5342_s0 + $0x158] sm:$0xff] }
  0xf9   : > { %3170 = vmatprep.subr.msk.bf16.mxu0 %vm3169_vm3, %v3168_v6  ;;  %3495 = vmatprep.subr.msk.bf16.mxu1 %vm3169_vm3, %v3168_v6  ;;  %v517_v17 = vld [vmem:[%s5342_s0 + $0x160] sm:$0xff]  ;;  %v480_v18 = vld [vmem:[%s5342_s0 + $0x38] sm:$0xff]  ;;  %v518_v20 = vld [vmem:[%s5342_s0 + $0x168] sm:$0xff] }
  0xfa   : > { %3128 = vmatprep.mubr.msk.f32.mxu1 %vm548_vm1, %v513_v11  ;;  %v481_v19 = vld [vmem:[%s5342_s0 + $0x40] sm:$0xff]  ;;  %v519_v21 = vld [vmem:[%s5342_s0 + $0x170] sm:$0xff]  ;;  %v482_v22 = vld [vmem:[%s5342_s0 + $0x48] sm:$0xff] }
  0xfb   : > { %v483_v23 = vld [vmem:[%s5342_s0 + $0x50] sm:$0xff]  ;;  %v520_v24 = vld [vmem:[%s5342_s0 + $0x178] sm:$0xff]  ;;  %v521_v25 = vld [vmem:[%s5342_s0 + $0x180] sm:$0xff] }
  0xfc   : > { %3173 = vmatpush3.bf16.msk.msra.mxu0 %vm3169_vm3, %v3168_v6  ;;  %3497 = vmatpush3.bf16.msk.msra.mxu1 %vm3169_vm3, %v3168_v6  ;;  %v484_v26 = vld [vmem:[%s5342_s0 + $0x58] sm:$0xff]  ;;  %v485_v27 = vld [vmem:[%s5342_s0 + $0x60] sm:$0xff]  ;;  %v522_v28 = vld [vmem:[%s5342_s0 + $0x188] sm:$0xff] }
  0xfd   : > { %v523_v29 = vld [vmem:[%s5342_s0 + $0x190] sm:$0xff]  ;;  %v486_v30 = vld [vmem:[%s5342_s0 + $0x68] sm:$0xff]  ;;  %v524_v32 = vld [vmem:[%s5342_s0 + $0x198] sm:$0xff] }
  0xfe   : > { %v487_v31 = vld [vmem:[%s5342_s0 + $0x70] sm:$0xff]  ;;  %v525_v33 = vld [vmem:[%s5342_s0 + $0x1a0] sm:$0xff]  ;;  %v488_v34 = vld [vmem:[%s5342_s0 + $0x78] sm:$0xff] }
  0xff   : > { %3069 = vmatmul.mubr.msk.f32.vlgmr.msra.gmra.mrb[0].mxu0 %vm548_vm1, %v474_v7  ;;  %3129 = vmatmul.mubr.msk.f32.vlgmr.msra.gmra.mrb[0].mxu1 %vm548_vm1, %v514_v12  ;;  %v489_v35 = vld [vmem:[%s5342_s0 + $0x80] sm:$0xff]  ;;  %v526_v36 = vld [vmem:[%s5342_s0 + $0x1a8] sm:$0xff]  ;;  %v527_v37 = vld [vmem:[%s5342_s0 + $0x1b0] sm:$0xff] }
 0x100   : > { %3071 = vmatprep.mubr.msk.f32.mxu0 %vm548_vm1, %v475_v8  ;;  %3131 = vmatprep.mubr.msk.f32.mxu1 %vm548_vm1, %v515_v13  ;;  %v490_v38 = vld [vmem:[%s5342_s0 + $0x88] sm:$0xff]  ;;  %v491_v39 = vld [vmem:[%s5342_s0 + $0x90] sm:$0xff]  ;;  %v528_v40 = vld [vmem:[%s5342_s0 + $0x1b8] sm:$0xff] }
 0x101   : > { %v529_v41 = vld [vmem:[%s5342_s0 + $0x1c0] sm:$0xff]  ;;  %v492_v42 = vld [vmem:[%s5342_s0 + $0x98] sm:$0xff]  ;;  %v530_v44 = vld [vmem:[%s5342_s0 + $0x1c8] sm:$0xff] }
 0x102   : > { %v493_v43 = vld [vmem:[%s5342_s0 + $0xa0] sm:$0xff]  ;;  %v531_v45 = vld [vmem:[%s5342_s0 + $0x1d0] sm:$0xff]  ;;  %v494_v46 = vld [vmem:[%s5342_s0 + $0xa8] sm:$0xff] }
 0x103   : > { %3072 = vmatmul.mubr.msk.f32.gmra.mrb[2].mxu0 %vm548_vm1, %v476_v9  ;;  %3132 = vmatmul.mubr.msk.f32.gmra.mrb[2].mxu1 %vm548_vm1, %v516_v16  ;;  %v495_v47 = vld [vmem:[%s5342_s0 + $0xb0] sm:$0xff]  ;;  %v532_v48 = vld [vmem:[%s5342_s0 + $0x1d8] sm:$0xff]  ;;  %v533_v49 = vld [vmem:[%s5342_s0 + $0x1e0] sm:$0xff] }
 0x104   : > { %3074 = vmatprep.mubr.msk.f32.mxu0 %vm548_vm1, %v477_v10  ;;  %3134 = vmatprep.mubr.msk.f32.mxu1 %vm548_vm1, %v517_v17  ;;  %v496_v50 = vld [vmem:[%s5342_s0 + $0xb8] sm:$0xff]  ;;  %v497_v51 = vld [vmem:[%s5342_s0 + $0xc0] sm:$0xff]  ;;  %v534_v52 = vld [vmem:[%s5342_s0 + $0x1e8] sm:$0xff] }
 0x105   : > { %v535_v53 = vld [vmem:[%s5342_s0 + $0x1f0] sm:$0xff]  ;;  %v498_v54 = vld [vmem:[%s5342_s0 + $0xc8] sm:$0xff]  ;;  %v536_v56 = vld [vmem:[%s5342_s0 + $0x1f8] sm:$0xff] }
 0x106   : > { %v499_v55 = vld [vmem:[%s5342_s0 + $0xd0] sm:$0xff]  ;;  %v500_v57 = vld [vmem:[%s5342_s0 + $0xd8] sm:$0xff]  ;;  %v501_v58 = vld [vmem:[%s5342_s0 + $0xe0] sm:$0xff] }
 0x107   : > { %3075 = vmatmul.mubr.msk.f32.gmra.mrb[4].mxu0 %vm548_vm1, %v478_v14  ;;  %3135 = vmatmul.mubr.msk.f32.gmra.mrb[4].mxu1 %vm548_vm1, %v518_v20  ;;  %v502_v59 = vld [vmem:[%s5342_s0 + $0xe8] sm:$0xff]  ;;  %v503_v60 = vld [vmem:[%s5342_s0 + $0xf0] sm:$0xff]  ;;  %v504_v61 = vld [vmem:[%s5342_s0 + $0xf8] sm:$0xff] }
 0x108   : > { %3077 = vmatprep.mubr.msk.f32.mxu0 %vm548_vm1, %v479_v15  ;;  %3137 = vmatprep.mubr.msk.f32.mxu1 %vm548_vm1, %v519_v21  ;;  %v505_v62 = vld [vmem:[%s5342_s0 + $0x100] sm:$0xff]  ;;  %v506_v63 = vld [vmem:[%s5342_s0 + $0x108] sm:$0xff]  ;;  %v507_v0 = vld [vmem:[%s5342_s0 + $0x110] sm:$0xff] }
 0x109   : > { %v508_v1 = vld [vmem:[%s5342_s0 + $0x118] sm:$0xff]  ;;  %v509_v2 = vld [vmem:[%s5342_s0 + $0x120] sm:$0xff]  ;;  %v510_v3 = vld [vmem:[%s5342_s0 + $0x128] sm:$0xff] }
 0x10a   : > { %v511_v4 = vld [vmem:[%s5342_s0 + $0x130] sm:$0xff]  ;;  %v512_v5 = vld [vmem:[%s5342_s0 + $0x138] sm:$0xff] }
 0x10b   : > { %3078 = vmatmul.mubr.msk.f32.gmra.mrb[6].mxu0 %vm548_vm1, %v480_v18  ;;  %3138 = vmatmul.mubr.msk.f32.gmra.mrb[6].mxu1 %vm548_vm1, %v520_v24  ;;  %v1335_v6 = vld [vmem:[#allocation6] sm:$0xff]  ;;  %v4858_v10 = vld [vmem:[#allocation3] ss:$0 sm:$0xff] }
 0x10c   : > { %3080 = vmatprep.mubr.msk.f32.mxu0 %vm548_vm1, %v481_v19  ;;  %3140 = vmatprep.mubr.msk.f32.mxu1 %vm548_vm1, %v521_v25  ;;  %v1339_v7 = vld [vmem:[#allocation6 + $0x20] sm:$0xff] }
 0x10d   : > { %v3506_v8 = vcombine.high %v1335_v6, %v1339_v7  ;;  %v3507_v9 = vcombine.low %v1335_v6, %v1339_v7 }
 0x10f   : > { %3081 = vmatmul.mubr.msk.f32.gmra.mrb[8].mxu0 %vm548_vm1, %v482_v22  ;;  %3141 = vmatmul.mubr.msk.f32.gmra.mrb[8].mxu1 %vm548_vm1, %v522_v28 }
 0x110   : > { %3083 = vmatprep.mubr.msk.f32.mxu0 %vm548_vm1, %v483_v23  ;;  %3143 = vmatprep.mubr.msk.f32.mxu1 %vm548_vm1, %v523_v29 }
 0x111   : > { %3175 = vmatprep.subr.bf16.mxu1 %v3506_v8 }
 0x112   : > { %3177 = vmatpush1.bf16.msra.mxu1 %v3507_v9  ;;  %v4249_v9 = vmov 0.0  }
 0x113   : > { %3084 = vmatmul.mubr.msk.f32.gmra.mrb[10].mxu0 %vm548_vm1, %v484_v26  ;;  %3144 = vmatmul.mubr.msk.f32.gmra.mrb[10].mxu1 %vm548_vm1, %v524_v32 }
 0x114   : > { %3086 = vmatprep.mubr.msk.f32.mxu0 %vm548_vm1, %v485_v27  ;;  %3146 = vmatprep.mubr.msk.f32.mxu1 %vm548_vm1, %v525_v33 }
 0x117   : > { %3087 = vmatmul.mubr.msk.f32.gmra.mrb[12].mxu0 %vm548_vm1, %v486_v30  ;;  %3147 = vmatmul.mubr.msk.f32.gmra.mrb[12].mxu1 %vm548_vm1, %v526_v36 }
 0x118   : > { %3089 = vmatprep.mubr.msk.f32.mxu0 %vm548_vm1, %v487_v31  ;;  %3149 = vmatprep.mubr.msk.f32.mxu1 %vm548_vm1, %v527_v37 }
 0x11b   : > { %3090 = vmatmul.mubr.msk.f32.gmra.mrb[14].mxu0 %vm548_vm1, %v488_v34  ;;  %3150 = vmatmul.mubr.msk.f32.gmra.mrb[14].mxu1 %vm548_vm1, %v528_v40 }
 0x11c   : > { %3092 = vmatprep.mubr.msk.f32.mxu0 %vm548_vm1, %v489_v35  ;;  %3152 = vmatprep.mubr.msk.f32.mxu1 %vm548_vm1, %v529_v41 }
 0x11f   : > { %3093 = vmatmul.mubr.msk.f32.gmra.mrb[16].mxu0 %vm548_vm1, %v490_v38  ;;  %3153 = vmatmul.mubr.msk.f32.gmra.mrb[16].mxu1 %vm548_vm1, %v530_v44 }
 0x120   : > { %3095 = vmatprep.mubr.msk.f32.mxu0 %vm548_vm1, %v491_v39  ;;  %3155 = vmatprep.mubr.msk.f32.mxu1 %vm548_vm1, %v531_v45 }
 0x123   : > { %3096 = vmatmul.mubr.msk.f32.gmra.mrb[18].mxu0 %vm548_vm1, %v492_v42  ;;  %3156 = vmatmul.mubr.msk.f32.gmra.mrb[18].mxu1 %vm548_vm1, %v532_v48 }
 0x124   : > { %3098 = vmatprep.mubr.msk.f32.mxu0 %vm548_vm1, %v493_v43  ;;  %3158 = vmatprep.mubr.msk.f32.mxu1 %vm548_vm1, %v533_v49 }
 0x127   : > { %3099 = vmatmul.mubr.msk.f32.gmra.mrb[20].mxu0 %vm548_vm1, %v494_v46  ;;  %3159 = vmatmul.mubr.msk.f32.gmra.mrb[20].mxu1 %vm548_vm1, %v534_v52  ;;  %v1343_v46 = vld [vmem:[#allocation6 + $0x40] sm:$0xff] }
 0x128   : > { %3101 = vmatprep.mubr.msk.f32.mxu0 %vm548_vm1, %v495_v47  ;;  %3161 = vmatprep.mubr.msk.f32.mxu1 %vm548_vm1, %v535_v53  ;;  %v1347_v47 = vld [vmem:[#allocation6 + $0x60] sm:$0xff] }
 0x12b   : > { %3102 = vmatmul.mubr.msk.f32.gmra.mrb[22].mxu0 %vm548_vm1, %v496_v50  ;;  %3162 = vmatmul.mubr.msk.f32.gmra.mrb[22].mxu1 %vm548_vm1, %v536_v56 }
 0x12c   : > { %3104 = vmatprep.mubr.msk.f32.mxu0 %vm548_vm1, %v497_v51  ;;  %1495 = vmatprep.mubr.f32.mxu1 %v4249_v9 }
 0x12f   : > { %3105 = vmatmul.mubr.msk.f32.gmra.mrb[24].mxu0 %vm548_vm1, %v498_v54  ;;  %v3508_v54 = vcombine.high %v1343_v46, %v1347_v47 }
 0x130   : > { %3107 = vmatprep.mubr.msk.f32.mxu0 %vm548_vm1, %v499_v55 }
 0x131   : > { %3179 = vmatprep.subr.bf16.mxu1 %v3508_v54 }
 0x133   : > { %3108 = vmatmul.mubr.msk.f32.gmra.mrb[26].mxu0 %vm548_vm1, %v500_v57 }
 0x134   : > { %3110 = vmatprep.mubr.msk.f32.mxu0 %vm548_vm1, %v501_v58 }
 0x137   : > { %3111 = vmatmul.mubr.msk.f32.gmra.mrb[28].mxu0 %vm548_vm1, %v502_v59 }
 0x138   : > { %3113 = vmatprep.mubr.msk.f32.mxu0 %vm548_vm1, %v503_v60 }
 0x13b   : > { %3114 = vmatmul.mubr.msk.f32.gmra.mrb[30].mxu0 %vm548_vm1, %v504_v61  ;;  %v3509_v61 = vcombine.low %v1343_v46, %v1347_v47 }
 0x13c   : > { %3116 = vmatprep.mubr.msk.f32.mxu0 %vm548_vm1, %v505_v62 }
 0x13d   : > { %3181 = vmatpush1.bf16.msra.mxu1 %v3509_v61 }
 0x13f   : > { %3117 = vmatmul.mubr.msk.f32.gmra.mrb[32].mxu0 %vm548_vm1, %v506_v63 }
 0x140   : > { %3119 = vmatprep.mubr.msk.f32.mxu0 %vm548_vm1, %v507_v0  ;;  %v4893_v0 = vld [vmem:[#allocation6 + $0x8] sm:$0xff] }
 0x143   : > { %3120 = vmatmul.mubr.msk.f32.gmra.mrb[34].mxu0 %vm548_vm1, %v508_v1  ;;  %v4895_v1 = vld [vmem:[#allocation6 + $0x28] sm:$0xff] }
 0x144   : > { %3122 = vmatprep.mubr.msk.f32.mxu0 %vm548_vm1, %v509_v2 }
 0x147   : > { %3123 = vmatmul.mubr.msk.f32.gmra.mrb[36].mxu0 %vm548_vm1, %v510_v3 }
 0x148   : > { %3125 = vmatprep.mubr.msk.f32.mxu0 %vm548_vm1, %v511_v4 }
 0x14b   : > { %3126 = vmatmul.mubr.msk.f32.gmra.mrb[38].mxu0 %vm548_vm1, %v512_v5 }
 0x1d2   : > { %v3070_v11 = vpop.f32.mrb[0].mxu0  ;;  %v4866_v23 = vpop.f32.mrb[0].mxu1 }
 0x1d3   : > { %v817_v12 = vadd.f32 %v3070_v11, %v4858_v10  ;;  %v811_v13 = vpop.f32.mrb[1].mxu0  ;;  %v4868_v25 = vpop.f32.mrb[1].mxu1 }
 0x1d4   : > { %v812_v14 = vadd.f32 %v4858_v10, %v811_v13 }
 0x1d5   : > { %v1131_v15 = vmax.f32 %v817_v12, 0.0 }
 0x1d6   : > { %v1130_v16 = vmax.f32 %v812_v14, 0.0  ;;  %v3073_v17 = vpop.f32.mrb[2].mxu0  ;;  %v4873_v33 = vpop.f32.mrb[2].mxu1  ;;  %v3510_v14 = vcombine.high %v4893_v0, %v4895_v1 }
 0x1d7   : > { %v1196_v18 = vsel %vm1194_vm4, %v1131_v15, 0.0  ;;  %v827_v19 = vadd.f32 %v3073_v17, %v4858_v10  ;;  %v821_v20 = vpop.f32.mrb[3].mxu0  ;;  %v4875_v35 = vpop.f32.mrb[3].mxu1 }
 0x1d8   : > { %v1195_v21 = vsel %vm1194_vm4, %v1130_v16, 0.0  ;;  %v822_v22 = vadd.f32 %v4858_v10, %v821_v20  ;;  %3183 = vmatprep.subr.bf16.mxu1 %v3510_v14 }
 0x1d9   : > { %v1197_v24 = vadd.f32 %v1196_v18, %v1195_v21  ;;  %v1133_v26 = vmax.f32 %v827_v19, 0.0  ;;  %v3511_v21 = vcombine.low %v4893_v0, %v4895_v1  ;;  %v1346_v1 = vld [vmem:[#allocation6 + $0x58] sm:$0xff] }
 0x1da   : > { %v1132_v27 = vmax.f32 %v822_v22, 0.0  ;;  %v3076_v28 = vpop.f32.mrb[4].mxu0  ;;  %v4881_v45 = vpop.f32.mrb[4].mxu1 }
 0x1db   : > { %v837_v29 = vadd.f32 %v3076_v28, %v4858_v10  ;;  %v831_v30 = vpop.f32.mrb[5].mxu0  ;;  %v1200_v36 = vsel %vm1194_vm4, %v1133_v26, 0.0  ;;  %v4883_v49 = vpop.f32.mrb[5].mxu1 }
 0x1dc   : > { %v1198_v31 = vsel %vm1194_vm4, %v1132_v27, 0.0  ;;  %v832_v32 = vadd.f32 %v4858_v10, %v831_v30 }
 0x1dd   : > { %v1199_v34 = vadd.f32 %v1198_v31, %v1197_v24  ;;  %v1135_v37 = vmax.f32 %v837_v29, 0.0 }
 0x1de   : > { %v1134_v38 = vmax.f32 %v832_v32, 0.0  ;;  %v3079_v39 = vpop.f32.mrb[6].mxu0  ;;  %v4889_v60 = vpop.f32.mrb[6].mxu1 }
 0x1df   : > { %v1201_v40 = vadd.f32 %v1200_v36, %v1199_v34  ;;  %v847_v41 = vadd.f32 %v3079_v39, %v4858_v10  ;;  %v841_v42 = vpop.f32.mrb[7].mxu0  ;;  %v1204_v50 = vsel %vm1194_vm4, %v1135_v37, 0.0  ;;  %v4891_v63 = vpop.f32.mrb[7].mxu1 }
 0x1e0   : > { %v1202_v43 = vsel %vm1194_vm4, %v1134_v38, 0.0  ;;  %v842_v44 = vadd.f32 %v4858_v10, %v841_v42 }
 0x1e1   : > { %v1203_v48 = vadd.f32 %v1202_v43, %v1201_v40  ;;  %v1137_v51 = vmax.f32 %v847_v41, 0.0 }
 0x1e2   : > { %v1136_v52 = vmax.f32 %v842_v44, 0.0  ;;  %v3082_v53 = vpop.f32.mrb[8].mxu0  ;;  %v4902_v13 = vpop.f32.mrb[8].mxu1 }
 0x1e3   : > { %v1205_v55 = vadd.f32 %v1204_v50, %v1203_v48  ;;  %v857_v56 = vadd.f32 %v3082_v53, %v4858_v10  ;;  %v851_v57 = vpop.f32.mrb[9].mxu0  ;;  %v1208_v2 = vsel %vm1194_vm4, %v1137_v51, 0.0  ;;  %v4906_v16 = vpop.f32.mrb[9].mxu1 }
 0x1e4   : > { %v1206_v58 = vsel %vm1194_vm4, %v1136_v52, 0.0  ;;  %v852_v59 = vadd.f32 %v4858_v10, %v851_v57 }
 0x1e5   : > { %v1207_v62 = vadd.f32 %v1206_v58, %v1205_v55  ;;  %v1139_v3 = vmax.f32 %v857_v56, 0.0 }
 0x1e6   : > { %v1138_v4 = vmax.f32 %v852_v59, 0.0  ;;  %v3085_v5 = vpop.f32.mrb[10].mxu0  ;;  %v4914_v29 = vpop.f32.mrb[10].mxu1 }
 0x1e7   : > { %v1209_v6 = vadd.f32 %v1208_v2, %v1207_v62  ;;  %v867_v7 = vadd.f32 %v3085_v5, %v4858_v10  ;;  %v861_v8 = vpop.f32.mrb[11].mxu0  ;;  %v1212_v17 = vsel %vm1194_vm4, %v1139_v3, 0.0  ;;  %v4916_v31 = vpop.f32.mrb[11].mxu1 }
 0x1e8   : > { %v1210_v11 = vsel %vm1194_vm4, %v1138_v4, 0.0  ;;  %v862_v12 = vadd.f32 %v4858_v10, %v861_v8 }
 0x1e9   : > { %v1211_v15 = vadd.f32 %v1210_v11, %v1209_v6  ;;  %v1141_v18 = vmax.f32 %v867_v7, 0.0 }
 0x1ea   : > { %v1140_v19 = vmax.f32 %v862_v12, 0.0  ;;  %v3088_v20 = vpop.f32.mrb[12].mxu0  ;;  %v4922_v43 = vpop.f32.mrb[12].mxu1 }
 0x1eb   : > { %v1213_v22 = vadd.f32 %v1212_v17, %v1211_v15  ;;  %v877_v24 = vadd.f32 %v3088_v20, %v4858_v10  ;;  %v871_v26 = vpop.f32.mrb[13].mxu0  ;;  %v1216_v32 = vsel %vm1194_vm4, %v1141_v18, 0.0  ;;  %v4924_v46 = vpop.f32.mrb[13].mxu1 }
 0x1ec   : > { %v1214_v27 = vsel %vm1194_vm4, %v1140_v19, 0.0  ;;  %v872_v28 = vadd.f32 %v4858_v10, %v871_v26 }
 0x1ed   : > { %v1215_v30 = vadd.f32 %v1214_v27, %v1213_v22  ;;  %v1143_v34 = vmax.f32 %v877_v24, 0.0 }
 0x1ee   : > { %v1142_v36 = vmax.f32 %v872_v28, 0.0  ;;  %v3091_v37 = vpop.f32.mrb[14].mxu0  ;;  %v4930_v57 = vpop.f32.mrb[14].mxu1 }
 0x1ef   : > { %v1217_v38 = vadd.f32 %v1216_v32, %v1215_v30  ;;  %v887_v39 = vadd.f32 %v3091_v37, %v4858_v10  ;;  %v881_v40 = vpop.f32.mrb[15].mxu0  ;;  %v1220_v47 = vsel %vm1194_vm4, %v1143_v34, 0.0  ;;  %v4932_v59 = vpop.f32.mrb[15].mxu1 }
 0x1f0   : > { %v1218_v41 = vsel %vm1194_vm4, %v1142_v36, 0.0  ;;  %v882_v42 = vadd.f32 %v4858_v10, %v881_v40 }
 0x1f1   : > { %v1219_v44 = vadd.f32 %v1218_v41, %v1217_v38  ;;  %v1145_v48 = vmax.f32 %v887_v39, 0.0 }
 0x1f2   : > { %v1144_v50 = vmax.f32 %v882_v42, 0.0  ;;  %v3094_v51 = vpop.f32.mrb[16].mxu0  ;;  %v4938_v11 = vpop.f32.mrb[16].mxu1 }
 0x1f3   : > { %v1221_v52 = vadd.f32 %v1220_v47, %v1219_v44  ;;  %v897_v53 = vadd.f32 %v3094_v51, %v4858_v10  ;;  %v891_v54 = vpop.f32.mrb[17].mxu0  ;;  %v1224_v61 = vsel %vm1194_vm4, %v1145_v48, 0.0  ;;  %v4940_v14 = vpop.f32.mrb[17].mxu1 }
 0x1f4   : > { %v1222_v55 = vsel %vm1194_vm4, %v1144_v50, 0.0  ;;  %v892_v56 = vadd.f32 %v4858_v10, %v891_v54 }
 0x1f5   : > { %v1223_v58 = vadd.f32 %v1222_v55, %v1221_v52  ;;  %v1147_v62 = vmax.f32 %v897_v53, 0.0 }
 0x1f6   : > { %v1146_v2 = vmax.f32 %v892_v56, 0.0  ;;  %v3097_v3 = vpop.f32.mrb[18].mxu0  ;;  %v4946_v28 = vpop.f32.mrb[18].mxu1 }
 0x1f7   : > { %v1225_v4 = vadd.f32 %v1224_v61, %v1223_v58  ;;  %v907_v5 = vadd.f32 %v3097_v3, %v4858_v10  ;;  %v901_v6 = vpop.f32.mrb[19].mxu0  ;;  %v1228_v15 = vsel %vm1194_vm4, %v1147_v62, 0.0  ;;  %v4948_v32 = vpop.f32.mrb[19].mxu1 }
 0x1f8   : > { %v1226_v7 = vsel %vm1194_vm4, %v1146_v2, 0.0  ;;  %v902_v8 = vadd.f32 %v4858_v10, %v901_v6 }
 0x1f9   : > { %v1227_v12 = vadd.f32 %v1226_v7, %v1225_v4  ;;  %v1149_v17 = vmax.f32 %v907_v5, 0.0 }
 0x1fa   : > { %v1148_v18 = vmax.f32 %v902_v8, 0.0  ;;  %v3100_v19 = vpop.f32.mrb[20].mxu0  ;;  %v4954_v47 = vpop.f32.mrb[20].mxu1 }
 0x1fb   : > { %v1229_v20 = vadd.f32 %v1228_v15, %v1227_v12  ;;  %v917_v22 = vadd.f32 %v3100_v19, %v4858_v10  ;;  %v911_v24 = vpop.f32.mrb[21].mxu0  ;;  %v1232_v34 = vsel %vm1194_vm4, %v1149_v17, 0.0  ;;  %v4956_v50 = vpop.f32.mrb[21].mxu1 }
 0x1fc   : > { %v1230_v26 = vsel %vm1194_vm4, %v1148_v18, 0.0  ;;  %v912_v27 = vadd.f32 %v4858_v10, %v911_v24 }
 0x1fd   : > { %v1231_v30 = vadd.f32 %v1230_v26, %v1229_v20  ;;  %v1151_v36 = vmax.f32 %v917_v22, 0.0 }
 0x1fe   : > { %v1150_v37 = vmax.f32 %v912_v27, 0.0  ;;  %v3103_v38 = vpop.f32.mrb[22].mxu0  ;;  %v4962_v2 = vpop.f32.mrb[22].mxu1 }
 0x1ff   : > { %v1233_v39 = vadd.f32 %v1232_v34, %v1231_v30  ;;  %v927_v40 = vadd.f32 %v3103_v38, %v4858_v10  ;;  %v921_v41 = vpop.f32.mrb[23].mxu0  ;;  %v1236_v51 = vsel %vm1194_vm4, %v1151_v36, 0.0  ;;  %v4964_v4 = vpop.f32.mrb[23].mxu1 }
 0x200   : > { %v1234_v42 = vsel %vm1194_vm4, %v1150_v37, 0.0  ;;  %v922_v44 = vadd.f32 %v4858_v10, %v921_v41 }
 0x201   : > { %v1235_v48 = vadd.f32 %v1234_v42, %v1233_v39  ;;  %v1153_v52 = vmax.f32 %v927_v40, 0.0 }
 0x202   : > { %v1152_v53 = vmax.f32 %v922_v44, 0.0  ;;  %v3106_v54 = vpop.f32.mrb[24].mxu0 }
 0x203   : > { %v1237_v55 = vadd.f32 %v1236_v51, %v1235_v48  ;;  %v937_v56 = vadd.f32 %v3106_v54, %v4858_v10  ;;  %v931_v58 = vpop.f32.mrb[25].mxu0  ;;  %v1240_v5 = vsel %vm1194_vm4, %v1153_v52, 0.0 }
 0x204   : > { %v1238_v61 = vsel %vm1194_vm4, %v1152_v53, 0.0  ;;  %v932_v62 = vadd.f32 %v4858_v10, %v931_v58 }
 0x205   : > { %v1239_v3 = vadd.f32 %v1238_v61, %v1237_v55  ;;  %v1155_v6 = vmax.f32 %v937_v56, 0.0 }
 0x206   : > { %v1154_v7 = vmax.f32 %v932_v62, 0.0  ;;  %v3109_v8 = vpop.f32.mrb[26].mxu0 }
 0x207   : > { %v1241_v12 = vadd.f32 %v1240_v5, %v1239_v3  ;;  %v947_v15 = vadd.f32 %v3109_v8, %v4858_v10  ;;  %v941_v17 = vpop.f32.mrb[27].mxu0  ;;  %v1244_v22 = vsel %vm1194_vm4, %v1155_v6, 0.0 }
 0x208   : > { %v1242_v18 = vsel %vm1194_vm4, %v1154_v7, 0.0  ;;  %v942_v19 = vadd.f32 %v4858_v10, %v941_v17 }
 0x209   : > { %v1243_v20 = vadd.f32 %v1242_v18, %v1241_v12  ;;  %v1157_v24 = vmax.f32 %v947_v15, 0.0 }
 0x20a   : > { %v1156_v26 = vmax.f32 %v942_v19, 0.0  ;;  %v3112_v27 = vpop.f32.mrb[28].mxu0 }
 0x20b   : > { %v1245_v30 = vadd.f32 %v1244_v22, %v1243_v20  ;;  %v957_v34 = vadd.f32 %v3112_v27, %v4858_v10  ;;  %v951_v36 = vpop.f32.mrb[29].mxu0  ;;  %v1248_v40 = vsel %vm1194_vm4, %v1157_v24, 0.0 }
 0x20c   : > { %v1246_v37 = vsel %vm1194_vm4, %v1156_v26, 0.0  ;;  %v952_v38 = vadd.f32 %v4858_v10, %v951_v36 }
 0x20d   : > { %v1247_v39 = vadd.f32 %v1246_v37, %v1245_v30  ;;  %v1159_v41 = vmax.f32 %v957_v34, 0.0 }
 0x20e   : > { %v1158_v42 = vmax.f32 %v952_v38, 0.0  ;;  %v3115_v44 = vpop.f32.mrb[30].mxu0 }
 0x20f   : > { %v1249_v48 = vadd.f32 %v1248_v40, %v1247_v39  ;;  %v967_v51 = vadd.f32 %v3115_v44, %v4858_v10  ;;  %v961_v52 = vpop.f32.mrb[31].mxu0  ;;  %v1252_v56 = vsel %vm1194_vm4, %v1159_v41, 0.0 }
 0x210   : > { %v1250_v53 = vsel %vm1194_vm4, %v1158_v42, 0.0  ;;  %v962_v54 = vadd.f32 %v4858_v10, %v961_v52 }
 0x211   : > { %v1251_v55 = vadd.f32 %v1250_v53, %v1249_v48  ;;  %v1161_v58 = vmax.f32 %v967_v51, 0.0  ;;  %v1012_v48 = vadd.f32 %v4858_v10, %v4868_v25 }
 0x212   : > { %v1160_v61 = vmax.f32 %v962_v54, 0.0  ;;  %v3118_v62 = vpop.f32.mrb[32].mxu0 }
 0x213   : > { %v1253_v3 = vadd.f32 %v1252_v56, %v1251_v55  ;;  %v977_v5 = vadd.f32 %v3118_v62, %v4858_v10  ;;  %v971_v6 = vpop.f32.mrb[33].mxu0  ;;  %v1256_v17 = vsel %vm1194_vm4, %v1161_v58, 0.0 }
 0x214   : > { %v1254_v7 = vsel %vm1194_vm4, %v1160_v61, 0.0  ;;  %v972_v8 = vadd.f32 %v4858_v10, %v971_v6  ;;  %v1170_v6 = vmax.f32 %v1012_v48, 0.0 }
 0x215   : > { %v1255_v12 = vadd.f32 %v1254_v7, %v1253_v3  ;;  %v1163_v15 = vmax.f32 %v977_v5, 0.0  ;;  %v1017_v5 = vadd.f32 %v4866_v23, %v4858_v10 }
 0x216   : > { %v1162_v18 = vmax.f32 %v972_v8, 0.0  ;;  %v3121_v19 = vpop.f32.mrb[34].mxu0  ;;  %v1279_v23 = vsel %vm1194_vm4, %v1170_v6, 0.0 }
 0x217   : > { %v4983_v20 = vadd.f32 %v1256_v17, %v1255_v12  ;;  %v1265_v22 = vsel %vm1194_vm4, %v1163_v15, 0.0  ;;  %v987_v24 = vadd.f32 %v3121_v19, %v4858_v10  ;;  %v981_v26 = vpop.f32.mrb[35].mxu0  ;;  %v1022_v12 = vadd.f32 %v4858_v10, %v4875_v35 }
 0x218   : > { %v1264_v27 = vsel %vm1194_vm4, %v1162_v18, 0.0  ;;  %v982_v30 = vadd.f32 %v4858_v10, %v981_v26  ;;  %v1171_v19 = vmax.f32 %v1017_v5, 0.0 }
 0x219   : > { %v1266_v34 = vadd.f32 %v1265_v22, %v1264_v27  ;;  %v1165_v36 = vmax.f32 %v987_v24, 0.0  ;;  %v1027_v22 = vadd.f32 %v4873_v33, %v4858_v10  ;;  %v1172_v26 = vmax.f32 %v1022_v12, 0.0 }
 0x21a   : > { %v1164_v37 = vmax.f32 %v982_v30, 0.0  ;;  %v3124_v38 = vpop.f32.mrb[36].mxu0  ;;  %v1032_v27 = vadd.f32 %v4858_v10, %v4883_v49  ;;  %v1042_v33 = vadd.f32 %v4858_v10, %v4891_v63  ;;  %v1047_v49 = vadd.f32 %v4889_v60, %v4858_v10 }
 0x21b   : > { %v997_v39 = vadd.f32 %v3124_v38, %v4858_v10  ;;  %v991_v40 = vpop.f32.mrb[37].mxu0  ;;  %v1269_v51 = vsel %vm1194_vm4, %v1165_v36, 0.0  ;;  %v1037_v36 = vadd.f32 %v4881_v45, %v4858_v10  ;;  %v1283_v38 = vsel %vm1194_vm4, %v1172_v26, 0.0 }
 0x21c   : > { %v1267_v41 = vsel %vm1194_vm4, %v1164_v37, 0.0  ;;  %v992_v42 = vadd.f32 %v4858_v10, %v991_v40  ;;  %v1173_v37 = vmax.f32 %v1027_v22, 0.0  ;;  %v1052_v45 = vadd.f32 %v4858_v10, %v4906_v16 }
 0x21d   : > { %v1268_v44 = vadd.f32 %v1267_v41, %v1266_v34  ;;  %v1167_v52 = vmax.f32 %v997_v39, 0.0  ;;  %v1281_v34 = vsel %vm1194_vm4, %v1171_v19, 0.0  ;;  %v1174_v39 = vmax.f32 %v1032_v27, 0.0 }
 0x21e   : > { %v1166_v53 = vmax.f32 %v992_v42, 0.0  ;;  %v3127_v54 = vpop.f32.mrb[38].mxu0  ;;  %v1175_v42 = vmax.f32 %v1037_v36, 0.0  ;;  %v1062_v60 = vadd.f32 %v4858_v10, %v4916_v31  ;;  %v1067_v16 = vadd.f32 %v4914_v29, %v4858_v10 }
 0x21f   : > { %v1270_v55 = vadd.f32 %v1269_v51, %v1268_v44  ;;  %v1007_v56 = vadd.f32 %v3127_v54, %v4858_v10  ;;  %v1001_v58 = vpop.f32.mrb[39].mxu0  ;;  %v1273_v25 = vsel %vm1194_vm4, %v1167_v52, 0.0  ;;  %v1285_v44 = vsel %vm1194_vm4, %v1173_v37, 0.0 }
 0x220   : > { %v1271_v61 = vsel %vm1194_vm4, %v1166_v53, 0.0  ;;  %v1002_v62 = vadd.f32 %v4858_v10, %v1001_v58  ;;  %v1287_v48 = vsel %vm1194_vm4, %v1174_v39, 0.0  ;;  %v1176_v51 = vmax.f32 %v1042_v33, 0.0 }
 0x221   : > { %v1272_v3 = vadd.f32 %v1271_v61, %v1270_v55  ;;  %v1169_v7 = vmax.f32 %v1007_v56, 0.0  ;;  %v1289_v53 = vsel %vm1194_vm4, %v1175_v42, 0.0  ;;  %v1177_v55 = vmax.f32 %v1047_v49, 0.0 }
 0x222   : > { %v1168_v8 = vmax.f32 %v1002_v62, 0.0  ;;  %v1291_v63 = vsel %vm1194_vm4, %v1176_v51, 0.0  ;;  %v1057_v56 = vadd.f32 %v4902_v13, %v4858_v10  ;;  %v1178_v58 = vmax.f32 %v1052_v45, 0.0 }
 0x223   : > { %v1274_v15 = vadd.f32 %v1273_v25, %v1272_v3  ;;  %v1277_v24 = vsel %vm1194_vm4, %v1169_v7, 0.0  ;;  %v1293_v62 = vsel %vm1194_vm4, %v1177_v55, 0.0  ;;  %v1180_v25 = vmax.f32 %v1062_v60, 0.0 }
 0x224   : > { %v1275_v17 = vsel %vm1194_vm4, %v1168_v8, 0.0  ;;  %v1179_v5 = vmax.f32 %v1057_v56, 0.0  ;;  %v1295_v6 = vsel %vm1194_vm4, %v1178_v58, 0.0  ;;  %v1072_v7 = vadd.f32 %v4858_v10, %v4924_v46 }
 0x225   : > { %v1276_v18 = vadd.f32 %v1275_v17, %v1274_v15  ;;  %v1181_v12 = vmax.f32 %v1067_v16, 0.0  ;;  %v1077_v31 = vadd.f32 %v4922_v43, %v4858_v10  ;;  %v1299_v17 = vsel %vm1194_vm4, %v1180_v25, 0.0 }
 0x226   : > { %v1297_v15 = vsel %vm1194_vm4, %v1179_v5, 0.0  ;;  %v1082_v29 = vadd.f32 %v4858_v10, %v4932_v59  ;;  %v1087_v26 = vadd.f32 %v4930_v57, %v4858_v10  ;;  %v1092_v43 = vadd.f32 %v4858_v10, %v4940_v14 }
 0x227   : > { %v1278_v30 = vadd.f32 %v1277_v24, %v1276_v18  ;;  %v1182_v18 = vmax.f32 %v1072_v7, 0.0  ;;  %v1301_v22 = vsel %vm1194_vm4, %v1181_v12, 0.0  ;;  %v1097_v59 = vadd.f32 %v4938_v11, %v4858_v10 }
 0x228   : > { %v1184_v27 = vmax.f32 %v1082_v29, 0.0  ;;  %v1185_v36 = vmax.f32 %v1087_v26, 0.0  ;;  %v1102_v39 = vadd.f32 %v4858_v10, %v4948_v32  ;;  %v1107_v14 = vadd.f32 %v4946_v28, %v4858_v10 }
 0x229   : > { %v1280_v35 = vadd.f32 %v1279_v23, %v1278_v30  ;;  %v1183_v23 = vmax.f32 %v1077_v31, 0.0  ;;  %v1303_v46 = vsel %vm1194_vm4, %v1182_v18, 0.0  ;;  %v1112_v11 = vadd.f32 %v4858_v10, %v4956_v50 }
 0x22a   : > { %v1307_v37 = vsel %vm1194_vm4, %v1184_v27, 0.0  ;;  %v1188_v49 = vmax.f32 %v1102_v39, 0.0  ;;  %v1189_v45 = vmax.f32 %v1107_v14, 0.0  ;;  %v1122_v28 = vadd.f32 %v4858_v10, %v4964_v4  ;;  %v1337_v27 = vld [vmem:[#allocation6 + $0x10] sm:$0xff]  ;;  %v1342_v39 = vld [vmem:[#allocation6 + $0x38] sm:$0xff] }
 0x22b   : > { %v1282_v40 = vadd.f32 %v1281_v34, %v1280_v35  ;;  %v1305_v34 = vsel %vm1194_vm4, %v1183_v23, 0.0  ;;  %v1258_v55 = vrot.slane %v4983_v20, 4  ;;  %v1127_v60 = vadd.f32 %v4962_v2, %v4858_v10 }
 0x22c   : > { %v1315_v32 = vsel %vm1194_vm4, %v1188_v49, 0.0 }
 0x22d   : > { %v1284_v41 = vadd.f32 %v1283_v38, %v1282_v40  ;;  %v1186_v38 = vmax.f32 %v1092_v43, 0.0  ;;  %v1187_v40 = vmax.f32 %v1097_v59, 0.0  ;;  %v1193_v4 = vmax.f32 %v1127_v60, 0.0  ;;  %v1341_v43 = vld [vmem:[#allocation6 + $0x30] sm:$0xff] }
 0x22e   : > { %v1349_v59 = vld [vmem:[#allocation6 + $0x70] sm:$0xff] }
 0x22f   : > { %v1286_v52 = vadd.f32 %v1285_v44, %v1284_v41  ;;  %v1309_v41 = vsel %vm1194_vm4, %v1185_v36, 0.0  ;;  %v1311_v42 = vsel %vm1194_vm4, %v1186_v38, 0.0  ;;  %v3515_v36 = vcombine.low %v1337_v27, %v1341_v43  ;;  %v1338_v38 = vld [vmem:[#allocation6 + $0x18] sm:$0xff] }
 0x230   : > { %v3518_v0 = vcombine.high %v1338_v38, %v1342_v39 }
 0x231   : > { %v1288_v54 = vadd.f32 %v1287_v48, %v1286_v52  ;;  %v1313_v48 = vsel %vm1194_vm4, %v1187_v40, 0.0  ;;  %v1117_v52 = vadd.f32 %v4954_v47, %v4858_v10  ;;  %v1259_v47 = vadd.f32 %v1258_v55, %v4983_v20 }
 0x232   : > { %v4250_v55 = vmov 1983009808  }
 0x233   : > { %v1290_v61 = vadd.f32 %v1289_v53, %v1288_v54  ;;  %v1190_v53 = vmax.f32 %v1112_v11, 0.0  ;;  %v1191_v56 = vmax.f32 %v1117_v52, 0.0  ;;  %v1260_v25 = vrot.slane %v1259_v47, 2 }
 0x235   : > { %v1292_v3 = vadd.f32 %v1291_v63, %v1290_v61  ;;  %v1317_v63 = vsel %vm1194_vm4, %v1189_v45, 0.0  ;;  %v1319_v58 = vsel %vm1194_vm4, %v1190_v53, 0.0  ;;  %v1192_v61 = vmax.f32 %v1122_v28, 0.0 }
 0x236   : > { %v1321_v16 = vsel %vm1194_vm4, %v1191_v56, 0.0  ;;  %v1261_v12 = vadd.f32 %v1260_v25, %v1259_v47 }
 0x237   : > { %v1294_v8 = vadd.f32 %v1293_v62, %v1292_v3  ;;  %v1323_v5 = vsel %vm1194_vm4, %v1192_v61, 0.0 }
 0x238   : > { %v1262_v10 = vrot.slane %v1261_v12, 1 }
 0x239   : > { %v1296_v13 = vadd.f32 %v1295_v6, %v1294_v8  ;;  %v1325_v8 = vsel %vm1194_vm4, %v1193_v4, 0.0 }
 0x23a   : > { %v1263_v18 = vadd.f32 %v1262_v10, %v1261_v12 }
 0x23b   : > { %v1298_v19 = vadd.f32 %v1297_v15, %v1296_v13 }
 0x23d   : > { %v1300_v24 = vadd.f32 %v1299_v17, %v1298_v19  ;;  %v1344_v19 = vld [vmem:[#allocation6 + $0x48] sm:$0xff] }
 0x23f   : > { %v1302_v30 = vadd.f32 %v1301_v22, %v1300_v24  ;;  %v1348_v22 = vld [vmem:[#allocation6 + $0x68] sm:$0xff]  ;;  %v1333_v24 = vmul.f32 0.00390625, %v1263_v18 }
 0x241   : > { %v1304_v35 = vadd.f32 %v1303_v46, %v1302_v30  ;;  %v3512_v46 = vcombine.high %v1344_v19, %v1348_v22  ;;  %v3513_v30 = vcombine.low %v1344_v19, %v1348_v22 }
 0x243   : > { %v1306_v33 = vadd.f32 %v1305_v34, %v1304_v35  ;;  %v3514_v34 = vcombine.high %v1337_v27, %v1341_v43  ;;  %v1345_v35 = vld [vmem:[#allocation6 + $0x50] sm:$0xff] }
 0x245   : > { %v1308_v57 = vadd.f32 %v1307_v37, %v1306_v33  ;;  %v3516_v37 = vcombine.high %v1345_v35, %v1349_v59  ;;  %v3517_v33 = vcombine.low %v1345_v35, %v1349_v59 }
 0x247   : > { %v1310_v44 = vadd.f32 %v1309_v41, %v1308_v57  ;;  %v3519_v57 = vcombine.low %v1338_v38, %v1342_v39  ;;  %v2870_v41 = vld [vmem:[#allocation14] ss:$0 sm:$0xff] }
 0x248   : > { %1769 = vst [vmem:[#allocation15] sm:$0x3] %v2870_v41 }
 0x249   : > { %v1312_v51 = vadd.f32 %v1311_v42, %v1310_v44  ;;  %v1385_v42 = vlaneseq  ;;  %v1383_v44 = vld [vmem:[#allocation8] sm:$0xff] }
 0x24b   : > { %v1314_v54 = vadd.f32 %v1313_v48, %v1312_v51  ;;  %v1386_v49 = vshrl.u32 %v1385_v42, 7 }
 0x24d   : > { %v1316_v50 = vadd.f32 %v1315_v32, %v1314_v54  ;;  %v1387_v11 = vsub.s32 0, %v1386_v49  ;;  %v1391_v48 = vsub.s32 1, %v1386_v49  ;;  %v1395_v28 = vsub.s32 2, %v1386_v49 }
 0x24e   : > { %v1415_v18 = vsub.s32 7, %v1386_v49 }
 0x24f   : > { %v1318_v62 = vadd.f32 %v1317_v63, %v1316_v50  ;;  %v1388_v51 = vrot.slane %v1383_v44, %v1387_v11  ;;  %v1392_v45 = vrot.slane %v1383_v44, %v1391_v48  ;;  %v1399_v63 = vsub.s32 3, %v1386_v49 }
 0x250   : > { %v1396_v56 = vrot.slane %v1383_v44, %v1395_v28  ;;  %v1416_v19 = vrot.slane %v1383_v44, %v1415_v18 }
 0x251   : > { %v1320_v3 = vadd.f32 %v1319_v58, %v1318_v62  ;;  %v1400_v60 = vrot.slane %v1383_v44, %v1399_v63 }
 0x253   : > { %v1322_v6 = vadd.f32 %v1321_v16, %v1320_v3  ;;  %v1403_v3 = vsub.s32 4, %v1386_v49 }
 0x255   : > { %v1324_v7 = vadd.f32 %v1323_v5, %v1322_v6  ;;  %v1407_v5 = vsub.s32 5, %v1386_v49  ;;  %v1404_v25 = vrot.slane %v1383_v44, %v1403_v3 }
 0x257   : > { %v1326_v13 = vadd.f32 %v1325_v8, %v1324_v7 }
 0x259   : > { %v1327_v31 = vrot.slane %v1326_v13, 4 }
 0x25b   : > { %v1328_v15 = vadd.f32 %v1327_v31, %v1326_v13  ;;  %v1408_v13 = vrot.slane %v1383_v44, %v1407_v5 }
 0x25d   : > { %v1329_v2 = vrot.slane %v1328_v15, 2 }
 0x25f   : > { %v1330_v17 = vadd.f32 %v1329_v2, %v1328_v15  ;;  %v1411_v2 = vsub.s32 6, %v1386_v49 }
 0x261   : > { %v1331_v20 = vrot.slane %v1330_v17, 1 }
 0x263   : > { %v1332_v29 = vadd.f32 %v1331_v20, %v1330_v17 }
 0x265   : > { %v1334_v23 = vmul.f32 0.00390625, %v1332_v29  ;;  %v1412_v29 = vrot.slane %v1383_v44, %v1411_v2 }
 0x267   : > { %v1428_v26 = vsel %vm1427_vm5, %v1334_v23, %v1333_v24 }
 0x268   : > { %2866 = vmatmul.mubr.msk.f32.vlgmr.msra.gmra.mrb[24].mxu1 %vm1194_vm4, %v1428_v26 }
 0x269   : > { %3185 = vmatpush1.bf16.msra.mxu1 %v3511_v21  ;;  %1566 = vmatprep.mubr.f32.mxu1 %v4249_v9  ;;  %v1350_v21 = vld [vmem:[#allocation6 + $0x78] sm:$0xff] }
 0x26a   : > { %3187 = vmatprep.subr.bf16.mxu1 %v3512_v46  ;;  %v3520_v40 = vcombine.high %v1346_v1, %v1350_v21  ;;  %v3521_v14 = vcombine.low %v1346_v1, %v1350_v21 }
 0x26d   : > { %3189 = vmatpush1.bf16.msra.mxu1 %v3513_v30 }
 0x26e   : > { %3191 = vmatprep.subr.bf16.mxu1 %v3514_v34 }
 0x270   : > { %2867 = vmatmul.mubr.msk.f32.vlgmr.msra.gmra.mrb[26].mxu1 %vm1194_vm4, %v1428_v26 }
 0x271   : > { %3193 = vmatpush1.bf16.msra.mxu1 %v3515_v36  ;;  %1637 = vmatprep.mubr.f32.mxu1 %v4249_v9 }
 0x272   : > { %3195 = vmatprep.subr.bf16.mxu1 %v3516_v37 }
 0x275   : > { %3197 = vmatpush1.bf16.msra.mxu1 %v3517_v33 }
 0x276   : > { %3199 = vmatprep.subr.bf16.mxu1 %v3518_v0 }
 0x278   : > { %2868 = vmatmul.mubr.msk.f32.vlgmr.msra.gmra.mrb[28].mxu1 %vm1194_vm4, %v1428_v26 }
 0x279   : > { %3201 = vmatpush1.bf16.msra.mxu1 %v3519_v57  ;;  %1708 = vmatprep.mubr.f32.mxu1 %v4249_v9  ;;  %v1726_v9 = vunpack.c.l.s4 %v4250_v55 }
 0x27a   : > { %3203 = vmatprep.subr.bf16.mxu1 %v3520_v40 }
 0x27b   : > { %v1727_v58 = vunpack.c.0.s8 %v1726_v9 }
 0x27d   : > { %3205 = vmatpush1.bf16.msra.mxu1 %v3521_v14  ;;  %v1730_v16 = vsub.s32 %v1727_v58, %v1386_v49 }
 0x280   : > { %2869 = vmatmul.mubr.msk.f32.vlgmr.msra.gmra.mrb[30].mxu1 %vm1194_vm4, %v1428_v26 }
 0x33b   : > { %v1497_v32 = vpop.f32.mrb[24].mxu1 }
 0x33c   : > { %v1498_v52 = vadd.f32 %v1497_v32, %v1388_v51  ;;  %v1499_v53 = vpop.f32.mrb[25].mxu1 }
 0x33d   : > { %v1500_v54 = vadd.f32 %v1499_v53, %v1392_v45 }
 0x33f   : > { %v1723_v50 = vcombine.low %v1498_v52, %v1500_v54 }
 0x341   : > { %v1731_v7 = vrot.slane %v1723_v50, %v1730_v16 }
 0x343   : > { %v1568_v61 = vpop.f32.mrb[26].mxu1 }
 0x344   : > { %v1569_v62 = vadd.f32 %v1568_v61, %v1396_v56  ;;  %v1570_v47 = vpop.f32.mrb[27].mxu1 }
 0x345   : > { %v1571_v4 = vadd.f32 %v1570_v47, %v1400_v60 }
 0x347   : > { %v1724_v6 = vcombine.low %v1569_v62, %v1571_v4 }
 0x349   : > { %v1738_v8 = vrot.slane %v1724_v6, %v1730_v16 }
 0x34b   : > { %v1739_v12 = vcombine.low %v1731_v7, %v1738_v8  ;;  %v1639_v31 = vpop.f32.mrb[28].mxu1 }
 0x34c   : > { %v1640_v15 = vadd.f32 %v1639_v31, %v1404_v25  ;;  %v1641_v10 = vpop.f32.mrb[29].mxu1 }
 0x34d   : > { %1759 = vst [vmem:[#allocation2] sm:$0xff] %v1739_v12  ;;  %v1642_v17 = vadd.f32 %v1641_v10, %v1408_v13 }
 0x34f   : > { %v1740_v20 = vcombine.low %v1640_v15, %v1642_v17 }
 0x351   : > { %v1748_v27 = vrot.slane %v1740_v20, %v1730_v16 }
 0x353   : > { %v1710_v22 = vpop.f32.mrb[30].mxu1 }
 0x354   : > { %v1711_v24 = vadd.f32 %v1710_v22, %v1412_v29  ;;  %v1712_v23 = vpop.f32.mrb[31].mxu1 }
 0x355   : > { %v1713_v46 = vadd.f32 %v1712_v23, %v1416_v19 }
 0x357   : > { %v1741_v26 = vcombine.low %v1711_v24, %v1713_v46 }
 0x359   : > { %v1755_v43 = vrot.slane %v1741_v26, %v1730_v16 }
 0x35b   : > { %v1756_v30 = vcombine.low %v1748_v27, %v1755_v43 }
 0x35d   : > { %1760 = vst [vmem:[#allocation2 + $0x8] sm:$0xff] %v1756_v30 }
 0x35e PF: > { %v3757_v34 = vld [vmem:[%s4570_s8 + $0x4] ss:$8 sps:$4 sm:$0xff]   ;;  %v3761_v59 = vld [vmem:[%s4570_s8] ss:$8 sps:$4 sm:$0xff]   ;;  %v3763_v37 = vld [vmem:[%s4570_s8 + $0x14] ss:$8 sps:$4 sm:$0xff]   ;;  %v2158_v47 = vlaneseq }
 0x35f   : > { %v3759_v35 = vld [vmem:[%s4570_s8 + $0x204] ss:$8 sps:$4 sm:$0xff]   ;;  %3207 = vmatprep.subr.bf16.mxu1 %v3757_v34  ;;  %v3762_v36 = vld [vmem:[%s4570_s8 + $0x200] ss:$8 sps:$4 sm:$0xff]   ;;  %v3765_v38 = vld [vmem:[%s4570_s8 + $0x214] ss:$8 sps:$4 sm:$0xff]  }
 0x360   : > { %3335 = vmatprep.subr.bf16.mxu0 %v3759_v35  ;;  %3209 = vmatpush1.bf16.msra.mxu1 %v3761_v59  ;;  %v3767_v39 = vld [vmem:[%s4570_s8 + $0x10] ss:$8 sps:$4 sm:$0xff]   ;;  %v3769_v0 = vld [vmem:[%s4570_s8 + $0x24] ss:$8 sps:$4 sm:$0xff]   ;;  %v3773_v21 = vld [vmem:[%s4570_s8 + $0x20] ss:$8 sps:$4 sm:$0xff]  }
 0x361   : > { %3337 = vmatpush1.bf16.msra.mxu0 %v3762_v36  ;;  %3211 = vmatprep.subr.bf16.mxu1 %v3763_v37  ;;  %v3768_v33 = vld [vmem:[%s4570_s8 + $0x210] ss:$8 sps:$4 sm:$0xff]   ;;  %v3771_v1 = vld [vmem:[%s4570_s8 + $0x224] ss:$8 sps:$4 sm:$0xff]   ;;  %v3774_v57 = vld [vmem:[%s4570_s8 + $0x220] ss:$8 sps:$4 sm:$0xff]  }
 0x362   : > { %3339 = vmatprep.subr.bf16.mxu0 %v3765_v38  ;;  %v3775_v40 = vld [vmem:[%s4570_s8 + $0x34] ss:$8 sps:$4 sm:$0xff]   ;;  %v3779_v41 = vld [vmem:[%s4570_s8 + $0x30] ss:$8 sps:$4 sm:$0xff]   ;;  %v3781_v49 = vld [vmem:[%s4570_s8 + $0x44] ss:$8 sps:$4 sm:$0xff]  }
 0x363   : > { %v3777_v14 = vld [vmem:[%s4570_s8 + $0x234] ss:$8 sps:$4 sm:$0xff]   ;;  %v3780_v42 = vld [vmem:[%s4570_s8 + $0x230] ss:$8 sps:$4 sm:$0xff]   ;;  %v3783_v11 = vld [vmem:[%s4570_s8 + $0x244] ss:$8 sps:$4 sm:$0xff]  }
 0x364   : > { %3213 = vmatpush1.bf16.msra.mxu1 %v3767_v39  ;;  %v3785_v44 = vld [vmem:[%s4570_s8 + $0x40] ss:$8 sps:$4 sm:$0xff]   ;;  %v3787_v51 = vld [vmem:[%s4570_s8 + $0x54] ss:$8 sps:$4 sm:$0xff]   ;;  %v3791_v32 = vld [vmem:[%s4570_s8 + $0x50] ss:$8 sps:$4 sm:$0xff]  }
 0x365   : > { %3341 = vmatpush1.bf16.msra.mxu0 %v3768_v33  ;;  %3215 = vmatprep.subr.bf16.mxu1 %v3769_v0  ;;  %v3786_v48 = vld [vmem:[%s4570_s8 + $0x240] ss:$8 sps:$4 sm:$0xff]   ;;  %v3789_v45 = vld [vmem:[%s4570_s8 + $0x254] ss:$8 sps:$4 sm:$0xff]   ;;  %v3792_v52 = vld [vmem:[%s4570_s8 + $0x250] ss:$8 sps:$4 sm:$0xff]  }
 0x366   : > { %3343 = vmatprep.subr.bf16.mxu0 %v3771_v1  ;;  %v3793_v53 = vld [vmem:[%s4570_s8 + $0x64] ss:$8 sps:$4 sm:$0xff]   ;;  %v3797_v54 = vld [vmem:[%s4570_s8 + $0x60] ss:$8 sps:$4 sm:$0xff]   ;;  %v3799_v9 = vld [vmem:[%s4570_s8 + $0x74] ss:$8 sps:$4 sm:$0xff]  }
 0x367   : > { %v3795_v28 = vld [vmem:[%s4570_s8 + $0x264] ss:$8 sps:$4 sm:$0xff]   ;;  %v3798_v55 = vld [vmem:[%s4570_s8 + $0x260] ss:$8 sps:$4 sm:$0xff]   ;;  %v3801_v63 = vld [vmem:[%s4570_s8 + $0x274] ss:$8 sps:$4 sm:$0xff]  }
 0x368   : > { %3217 = vmatpush1.bf16.msra.mxu1 %v3773_v21  ;;  %v3803_v50 = vld [vmem:[%s4570_s8 + $0x70] ss:$8 sps:$4 sm:$0xff]   ;;  %v3805_v58 = vld [vmem:[%s4570_s8 + $0x84] ss:$8 sps:$4 sm:$0xff]   ;;  %v3809_v61 = vld [vmem:[%s4570_s8 + $0x80] ss:$8 sps:$4 sm:$0xff]  }
 0x369   : > { %3345 = vmatpush1.bf16.msra.mxu0 %v3774_v57  ;;  %3219 = vmatprep.subr.bf16.mxu1 %v3775_v40  ;;  %v3804_v56 = vld [vmem:[%s4570_s8 + $0x270] ss:$8 sps:$4 sm:$0xff]   ;;  %v3807_v60 = vld [vmem:[%s4570_s8 + $0x284] ss:$8 sps:$4 sm:$0xff]   ;;  %v3810_v62 = vld [vmem:[%s4570_s8 + $0x280] ss:$8 sps:$4 sm:$0xff]  }
 0x36a   : > { %3347 = vmatprep.subr.bf16.mxu0 %v3777_v14  ;;  %v4251_v3 = vmov 1983009808   ;;  %v3811_v4 = vld [vmem:[%s4570_s8 + $0x94] ss:$8 sps:$4 sm:$0xff]   ;;  %v3815_v6 = vld [vmem:[%s4570_s8 + $0x90] ss:$8 sps:$4 sm:$0xff]  }
 0x36b   : > { %v2172_v16 = vunpack.c.l.s4 %v4251_v3  ;;  %v3813_v5 = vld [vmem:[%s4570_s8 + $0x294] ss:$8 sps:$4 sm:$0xff]   ;;  %v5122_v25 = vshrl.u32 %v2158_v47, 7  ;;  %v3816_v8 = vld [vmem:[%s4570_s8 + $0x290] ss:$8 sps:$4 sm:$0xff]   ;;  %v1770_v18 = vld [vmem:[#allocation2] sm:$0xff] }
 0x36c   : > { %3221 = vmatpush1.bf16.msra.mxu1 %v3779_v41  ;;  %v3817_v13 = vld [vmem:[%s4570_s8 + $0xa4] ss:$8 sps:$4 sm:$0xff]   ;;  %v3821_v31 = vld [vmem:[%s4570_s8 + $0xa0] ss:$8 sps:$4 sm:$0xff]   ;;  %v3823_v2 = vld [vmem:[%s4570_s8 + $0xb4] ss:$8 sps:$4 sm:$0xff]   ;;  %v2170_v21 = vcombine.high %v1770_v18, %v1770_v18 }
 0x36d   : > { %3349 = vmatpush1.bf16.msra.mxu0 %v3780_v42  ;;  %3223 = vmatprep.subr.bf16.mxu1 %v3781_v49  ;;  %v2173_v7 = vunpack.c.0.s8 %v2172_v16  ;;  %v3819_v12 = vld [vmem:[%s4570_s8 + $0x2a4] ss:$8 sps:$4 sm:$0xff]   ;;  %v3822_v15 = vld [vmem:[%s4570_s8 + $0x2a0] ss:$8 sps:$4 sm:$0xff]   ;;  %v3825_v17 = vld [vmem:[%s4570_s8 + $0x2b4] ss:$8 sps:$4 sm:$0xff]  }
 0x36e   : > { %3351 = vmatprep.subr.bf16.mxu0 %v3783_v11  ;;  %v3827_v20 = vld [vmem:[%s4570_s8 + $0xb0] ss:$8 sps:$4 sm:$0xff]   ;;  %v3829_v24 = vld [vmem:[%s4570_s8 + $0xc4] ss:$8 sps:$4 sm:$0xff]   ;;  %v3833_v43 = vld [vmem:[%s4570_s8 + $0xc0] ss:$8 sps:$4 sm:$0xff]  }
 0x36f   : > { %v2176_v10 = vsub.s32 %v2173_v7, %v5122_v25  ;;  %v3828_v19 = vld [vmem:[%s4570_s8 + $0x2b0] ss:$8 sps:$4 sm:$0xff]   ;;  %v3831_v23 = vld [vmem:[%s4570_s8 + $0x2c4] ss:$8 sps:$4 sm:$0xff]   ;;  %v3834_v30 = vld [vmem:[%s4570_s8 + $0x2c0] ss:$8 sps:$4 sm:$0xff]  }
 0x370   : > { %3225 = vmatpush1.bf16.msra.mxu1 %v3785_v44  ;;  %v1771_v22 = vld [vmem:[#allocation2 + $0x8] sm:$0xff]  ;;  %v3845_v39 = vld [vmem:[%s4570_s8 + $0xe0] ss:$8 sps:$4 sm:$0xff]   ;;  %p3708_p1 = scmp.eq.s32.totalorder %s4322_s13, 3 }
 0x371   : > { %3353 = vmatpush1.bf16.msra.mxu0 %v3786_v48  ;;  %3227 = vmatprep.subr.bf16.mxu1 %v3787_v51  ;;  %v2177_v29 = vrot.slane %v1770_v18, %v2176_v10  ;;  %v2194_v26 = vrot.slane %v1771_v22, %v2176_v10  ;;  %v3835_v34 = vld [vmem:[%s4570_s8 + $0xd4] ss:$8 sps:$4 sm:$0xff]   ;;  %v3839_v59 = vld [vmem:[%s4570_s8 + $0xd0] ss:$8 sps:$4 sm:$0xff]   ;;  %v3841_v37 = vld [vmem:[%s4570_s8 + $0xe4] ss:$8 sps:$4 sm:$0xff]   ;;  %v2187_v57 = vcombine.high %v1771_v22, %v1771_v22 }
 0x372   : > { %3355 = vmatprep.subr.bf16.mxu0 %v3789_v45  ;;  %v3837_v35 = vld [vmem:[%s4570_s8 + $0x2d4] ss:$8 sps:$4 sm:$0xff]   ;;  %v3840_v36 = vld [vmem:[%s4570_s8 + $0x2d0] ss:$8 sps:$4 sm:$0xff]   ;;  %v3843_v38 = vld [vmem:[%s4570_s8 + $0x2e4] ss:$8 sps:$4 sm:$0xff]   ;;  %v5152_v49 = vrot.slane %v2170_v21, %v2176_v10 }
 0x373   : > { %v2185_v46 = vcombine.high %v2177_v29, %v2177_v29  ;;  %v2202_v27 = vcombine.high %v2194_v26, %v2194_v26  ;;  %v3846_v33 = vld [vmem:[%s4570_s8 + $0x2e0] ss:$8 sps:$4 sm:$0xff]   ;;  %v3847_v0 = vld [vmem:[%s4570_s8 + $0xf4] ss:$8 sps:$4 sm:$0xff]   ;;  %v3851_v40 = vld [vmem:[%s4570_s8 + $0xf0] ss:$8 sps:$4 sm:$0xff]   ;;  %v5154_v11 = vrot.slane %v2187_v57, %v2176_v10 }
 0x374   : > { %3229 = vmatpush1.bf16.msra.mxu1 %v3791_v32  ;;  %v3849_v1 = vld [vmem:[%s4570_s8 + $0x2f4] ss:$8 sps:$4 sm:$0xff]   ;;  %v3852_v14 = vld [vmem:[%s4570_s8 + $0x2f0] ss:$8 sps:$4 sm:$0xff]   ;;  %v3854_v41 = vld [vmem:[%s4570_s8 + $0x104] ss:$8 sps:$4 sm:$0xff]   ;;  %v2186_v32 = vcombine.high %v5152_v49, %v5152_v49 }
 0x375   : > { %3357 = vmatpush1.bf16.msra.mxu0 %v3792_v52  ;;  %3231 = vmatprep.subr.bf16.mxu1 %v3793_v53  ;;  %v3858_v42 = vld [vmem:[%s4570_s8 + $0x304] ss:$8 sps:$4 sm:$0xff]   ;;  %v3856_v44 = vld [vmem:[%s4570_s8 + $0x100] ss:$8 sps:$4 sm:$0xff]   ;;  %v3861_v51 = vld [vmem:[%s4570_s8 + $0x114] ss:$8 sps:$4 sm:$0xff]   ;;  %v2203_v52 = vcombine.high %v5154_v11, %v5154_v11 }
 0x376   : > { %3359 = vmatprep.subr.bf16.mxu0 %v3795_v28  ;;  %2276 = vmatprep.mubr.f32.mxu1 %v2185_v46  ;;  %v3860_v48 = vld [vmem:[%s4570_s8 + $0x300] ss:$8 sps:$4 sm:$0xff]   ;;  %v3864_v45 = vld [vmem:[%s4570_s8 + $0x314] ss:$8 sps:$4 sm:$0xff]   ;;  %v3863_v53 = vld [vmem:[%s4570_s8 + $0x110] ss:$8 sps:$4 sm:$0xff]  }
 0x377   : > { %2418 = vmatprep.mubr.f32.mxu0 %v2202_v27  ;;  %v3866_v28 = vld [vmem:[%s4570_s8 + $0x310] ss:$8 sps:$4 sm:$0xff]   ;;  %v3881_v47 = vld [vmem:[%s4570_s8 + $0x140] ss:$8 sps:$4 sm:$0xff]   ;;  %v3885_v16 = vld [vmem:[%s4570_s8 + $0x154] ss:$8 sps:$4 sm:$0xff]  }
 0x378   : > { %3233 = vmatpush1.bf16.msra.mxu1 %v3797_v54  ;;  %v3867_v54 = vld [vmem:[%s4570_s8 + $0x124] ss:$8 sps:$4 sm:$0xff]   ;;  %v3884_v3 = vld [vmem:[%s4570_s8 + $0x340] ss:$8 sps:$4 sm:$0xff]   ;;  %v3899_v10 = vld [vmem:[%s4570_s8 + $0x170] ss:$8 sps:$4 sm:$0xff]  }
 0x379   : > { %3361 = vmatpush1.bf16.msra.mxu0 %v3798_v55  ;;  %3235 = vmatprep.subr.bf16.mxu1 %v3799_v9  ;;  %v3870_v55 = vld [vmem:[%s4570_s8 + $0x324] ss:$8 sps:$4 sm:$0xff]   ;;  %v3869_v9 = vld [vmem:[%s4570_s8 + $0x120] ss:$8 sps:$4 sm:$0xff]   ;;  %v3912_v22 = vld [vmem:[%s4570_s8 + $0x394] ss:$8 sps:$4 sm:$0xff]  }
 0x37a   : > { %3363 = vmatprep.subr.bf16.mxu0 %v3801_v63  ;;  %v3872_v63 = vld [vmem:[%s4570_s8 + $0x320] ss:$8 sps:$4 sm:$0xff]   ;;  %v3891_v7 = vld [vmem:[%s4570_s8 + $0x164] ss:$8 sps:$4 sm:$0xff]   ;;  %v3938_v21 = vld [vmem:[%s4570_s8 + $0x3d0] ss:$8 sps:$4 sm:$0xff]  }
 0x37b   : > { %v3906_v18 = vld [vmem:[%s4570_s8 + $0x384] ss:$8 sps:$4 sm:$0xff]   ;;  %v3917_v27 = vld [vmem:[%s4570_s8 + $0x1a0] ss:$8 sps:$4 sm:$0xff]  }
 0x37c   : > { %3237 = vmatpush1.bf16.msra.mxu1 %v3803_v50  ;;  %v3873_v50 = vld [vmem:[%s4570_s8 + $0x134] ss:$8 sps:$4 sm:$0xff]   ;;  %v3915_v46 = vld [vmem:[%s4570_s8 + $0x1a4] ss:$8 sps:$4 sm:$0xff]  }
 0x37d   : > { %3365 = vmatpush1.bf16.msra.mxu0 %v3804_v56  ;;  %3239 = vmatprep.subr.bf16.mxu1 %v3805_v58  ;;  %v3876_v56 = vld [vmem:[%s4570_s8 + $0x334] ss:$8 sps:$4 sm:$0xff]   ;;  %v3875_v58 = vld [vmem:[%s4570_s8 + $0x130] ss:$8 sps:$4 sm:$0xff]   ;;  %v3939_v57 = vld [vmem:[%s4570_s8 + $0x1e4] ss:$8 sps:$4 sm:$0xff]  }
 0x37e   : > { %3367 = vmatprep.subr.bf16.mxu0 %v3807_v60  ;;  %v3878_v60 = vld [vmem:[%s4570_s8 + $0x330] ss:$8 sps:$4 sm:$0xff]  }
 0x380   : > { %3241 = vmatpush1.bf16.msra.mxu1 %v3809_v61  ;;  %v3879_v61 = vld [vmem:[%s4570_s8 + $0x144] ss:$8 sps:$4 sm:$0xff]  }
 0x381   : > { %3369 = vmatpush1.bf16.msra.mxu0 %v3810_v62  ;;  %3243 = vmatprep.subr.bf16.mxu1 %v3811_v4  ;;  %v3882_v62 = vld [vmem:[%s4570_s8 + $0x344] ss:$8 sps:$4 sm:$0xff]   ;;  %v3888_v4 = vld [vmem:[%s4570_s8 + $0x354] ss:$8 sps:$4 sm:$0xff]  }
 0x382   : > { %3371 = vmatprep.subr.bf16.mxu0 %v3813_v5  ;;  %v3887_v5 = vld [vmem:[%s4570_s8 + $0x150] ss:$8 sps:$4 sm:$0xff]  }
 0x384   : > { %3245 = vmatpush1.bf16.msra.mxu1 %v3815_v6  ;;  %v3890_v6 = vld [vmem:[%s4570_s8 + $0x350] ss:$8 sps:$4 sm:$0xff]  }
 0x385   : > { %3373 = vmatpush1.bf16.msra.mxu0 %v3816_v8  ;;  %3247 = vmatprep.subr.bf16.mxu1 %v3817_v13  ;;  %v3894_v8 = vld [vmem:[%s4570_s8 + $0x364] ss:$8 sps:$4 sm:$0xff]   ;;  %v3893_v13 = vld [vmem:[%s4570_s8 + $0x160] ss:$8 sps:$4 sm:$0xff]  }
 0x386   : > { %3375 = vmatprep.subr.bf16.mxu0 %v3819_v12  ;;  %v3896_v12 = vld [vmem:[%s4570_s8 + $0x360] ss:$8 sps:$4 sm:$0xff]  }
 0x388   : > { %3249 = vmatpush1.bf16.msra.mxu1 %v3821_v31  ;;  %v3897_v31 = vld [vmem:[%s4570_s8 + $0x174] ss:$8 sps:$4 sm:$0xff]  }
 0x389   : > { %3377 = vmatpush1.bf16.msra.mxu0 %v3822_v15  ;;  %3251 = vmatprep.subr.bf16.mxu1 %v3823_v2  ;;  %v3900_v15 = vld [vmem:[%s4570_s8 + $0x374] ss:$8 sps:$4 sm:$0xff]   ;;  %v3902_v2 = vld [vmem:[%s4570_s8 + $0x370] ss:$8 sps:$4 sm:$0xff]  }
 0x38a   : > { %3379 = vmatprep.subr.bf16.mxu0 %v3825_v17  ;;  %v3903_v17 = vld [vmem:[%s4570_s8 + $0x184] ss:$8 sps:$4 sm:$0xff]  }
 0x38c   : > { %3253 = vmatpush1.bf16.msra.mxu1 %v3827_v20  ;;  %v3905_v20 = vld [vmem:[%s4570_s8 + $0x180] ss:$8 sps:$4 sm:$0xff]  }
 0x38d   : > { %3381 = vmatpush1.bf16.msra.mxu0 %v3828_v19  ;;  %3255 = vmatprep.subr.bf16.mxu1 %v3829_v24  ;;  %v3909_v19 = vld [vmem:[%s4570_s8 + $0x194] ss:$8 sps:$4 sm:$0xff]   ;;  %v3911_v24 = vld [vmem:[%s4570_s8 + $0x190] ss:$8 sps:$4 sm:$0xff]  }
 0x38e   : > { %3383 = vmatprep.subr.bf16.mxu0 %v3831_v23  ;;  %v3914_v23 = vld [vmem:[%s4570_s8 + $0x390] ss:$8 sps:$4 sm:$0xff]  }
 0x390   : > { %3257 = vmatpush1.bf16.msra.mxu1 %v3833_v43  ;;  %v3920_v43 = vld [vmem:[%s4570_s8 + $0x3a0] ss:$8 sps:$4 sm:$0xff]  }
 0x391   : > { %3385 = vmatpush1.bf16.msra.mxu0 %v3834_v30  ;;  %3259 = vmatprep.subr.bf16.mxu1 %v3835_v34  ;;  %v3921_v30 = vld [vmem:[%s4570_s8 + $0x1b4] ss:$8 sps:$4 sm:$0xff]  }
 0x392   : > { %3387 = vmatprep.subr.bf16.mxu0 %v3837_v35  ;;  %v3924_v34 = vld [vmem:[%s4570_s8 + $0x3b4] ss:$8 sps:$4 sm:$0xff]   ;;  %v3923_v35 = vld [vmem:[%s4570_s8 + $0x1b0] ss:$8 sps:$4 sm:$0xff]  }
 0x394   : > { %3261 = vmatpush1.bf16.msra.mxu1 %v3839_v59  ;;  %v3926_v59 = vld [vmem:[%s4570_s8 + $0x3b0] ss:$8 sps:$4 sm:$0xff]  }
 0x395   : > { %3389 = vmatpush1.bf16.msra.mxu0 %v3840_v36  ;;  %3263 = vmatprep.subr.bf16.mxu1 %v3841_v37  ;;  %v3927_v36 = vld [vmem:[%s4570_s8 + $0x1c4] ss:$8 sps:$4 sm:$0xff]  }
 0x396   : > { %3391 = vmatprep.subr.bf16.mxu0 %v3843_v38  ;;  %v3930_v37 = vld [vmem:[%s4570_s8 + $0x3c4] ss:$8 sps:$4 sm:$0xff]   ;;  %v3929_v38 = vld [vmem:[%s4570_s8 + $0x1c0] ss:$8 sps:$4 sm:$0xff]  }
 0x398   : > { %3265 = vmatpush1.bf16.msra.mxu1 %v3845_v39  ;;  %v3932_v39 = vld [vmem:[%s4570_s8 + $0x3c0] ss:$8 sps:$4 sm:$0xff]  }
 0x399   : > { %3393 = vmatpush1.bf16.msra.mxu0 %v3846_v33  ;;  %3267 = vmatprep.subr.bf16.mxu1 %v3847_v0  ;;  %v3933_v33 = vld [vmem:[%s4570_s8 + $0x1d4] ss:$8 sps:$4 sm:$0xff]  }
 0x39a   : > { %3395 = vmatprep.subr.bf16.mxu0 %v3849_v1  ;;  %v3936_v0 = vld [vmem:[%s4570_s8 + $0x3d4] ss:$8 sps:$4 sm:$0xff]   ;;  %v3935_v1 = vld [vmem:[%s4570_s8 + $0x1d0] ss:$8 sps:$4 sm:$0xff]  }
 0x39c   : > { %3269 = vmatpush1.bf16.msra.mxu1 %v3851_v40  ;;  %v3942_v40 = vld [vmem:[%s4570_s8 + $0x3e4] ss:$8 sps:$4 sm:$0xff]  }
 0x39d   : > { %3397 = vmatpush1.bf16.msra.mxu0 %v3852_v14  ;;  %3271 = vmatprep.subr.bf16.mxu1 %v3854_v41  ;;  %v3941_v14 = vld [vmem:[%s4570_s8 + $0x1e0] ss:$8 sps:$4 sm:$0xff]  }
 0x39e   : > { %3399 = vmatprep.subr.bf16.mxu0 %v3858_v42  ;;  %v3944_v41 = vld [vmem:[%s4570_s8 + $0x3e0] ss:$8 sps:$4 sm:$0xff]   ;;  %v3945_v42 = vld [vmem:[%s4570_s8 + $0x1f4] ss:$8 sps:$4 sm:$0xff]  }
 0x39f   : > { %2277 = vmatmul.mubr.f32.vlgmr.msra.gmra.mrb[0].mxu1 %v2177_v29  ;;  %v3908_v29 = vld [vmem:[%s4570_s8 + $0x380] ss:$8 sps:$4 sm:$0xff]  }
 0x3a0   : > { %2419 = vmatmul.mubr.f32.vlgmr.msra.gmra.mrb[0].mxu0 %v2194_v26  ;;  %3273 = vmatpush1.bf16.msra.mxu1 %v3856_v44  ;;  %v3918_v26 = vld [vmem:[%s4570_s8 + $0x3a4] ss:$8 sps:$4 sm:$0xff]   ;;  %v3948_v44 = vld [vmem:[%s4570_s8 + $0x3f4] ss:$8 sps:$4 sm:$0xff]  }
 0x3a1   : > { %3401 = vmatpush1.bf16.msra.mxu0 %v3860_v48  ;;  %3275 = vmatprep.subr.bf16.mxu1 %v3861_v51  ;;  %v3947_v48 = vld [vmem:[%s4570_s8 + $0x1f0] ss:$8 sps:$4 sm:$0xff]  }
 0x3a2   : > { %3403 = vmatprep.subr.bf16.mxu0 %v3864_v45  ;;  %2347 = vmatprep.mubr.f32.mxu1 %v2186_v32  ;;  %v3950_v51 = vld [vmem:[%s4570_s8 + $0x3f0] ss:$8 sps:$4 sm:$0xff]   ;;  %v2949_v45 = vld [vmem:[%s4578_s18 + $0x40] sm:$0xff]   ;;  %s4252_s8 = smov [#allocation15]  }
 0x3a3   : > { %2489 = vmatprep.mubr.f32.mxu0 %v2203_v52  ;;  %v2879_v32 = vld [vmem:[%s4578_s18] sm:$0xff]   ;;  %v2950_v52 = vld [vmem:[%s4578_s18 + $0x48] sm:$0xff]  }
 0x3a4   : > { %3277 = vmatpush1.bf16.msra.mxu1 %v3863_v53  ;;  %v2942_v53 = vld [vmem:[%s4578_s18 + $0x8] sm:$0xff]  }
 0x3a5   : > { %3405 = vmatpush1.bf16.msra.mxu0 %v3866_v28  ;;  %3279 = vmatprep.subr.bf16.mxu1 %v3867_v54  ;;  %v2951_v28 = vld [vmem:[%s4578_s18 + $0x50] sm:$0xff]  }
 0x3a6   : > { %3407 = vmatprep.subr.bf16.mxu0 %v3870_v55  ;;  %v2943_v54 = vld [vmem:[%s4578_s18 + $0x10] sm:$0xff]   ;;  %v2952_v55 = vld [vmem:[%s4578_s18 + $0x58] sm:$0xff]  }
 0x3a8   : > { %3281 = vmatpush1.bf16.msra.mxu1 %v3869_v9  ;;  %v2944_v9 = vld [vmem:[%s4578_s18 + $0x18] sm:$0xff]  }
 0x3a9   : > { %3409 = vmatpush1.bf16.msra.mxu0 %v3872_v63  ;;  %3283 = vmatprep.subr.bf16.mxu1 %v3873_v50  ;;  %v2954_v63 = vld [vmem:[%s4578_s18 + $0x68] sm:$0xff]  }
 0x3aa   : > { %3411 = vmatprep.subr.bf16.mxu0 %v3876_v56  ;;  %v2946_v50 = vld [vmem:[%s4578_s18 + $0x28] sm:$0xff]   ;;  %v2955_v56 = vld [vmem:[%s4578_s18 + $0x70] sm:$0xff]  }
 0x3ac   : > { %3285 = vmatpush1.bf16.msra.mxu1 %v3875_v58  ;;  %v2947_v58 = vld [vmem:[%s4578_s18 + $0x30] sm:$0xff]  }
 0x3ad   : > { %3413 = vmatpush1.bf16.msra.mxu0 %v3878_v60  ;;  %3287 = vmatprep.subr.bf16.mxu1 %v3879_v61  ;;  %v2956_v60 = vld [vmem:[%s4578_s18 + $0x78] sm:$0xff]  }
 0x3ae   : > { %3415 = vmatprep.subr.bf16.mxu0 %v3882_v62  ;;  %v2948_v61 = vld [vmem:[%s4578_s18 + $0x38] sm:$0xff]   ;;  %v2160_v62 = vsub.s32 0, %v5122_v25 }
 0x3b0   : > { %3289 = vmatpush1.bf16.msra.mxu1 %v3881_v47  ;;  %v2156_v47 = vld [vmem:[%s4576_s9] sm:$0x3]  ;;  %s2642_s9 = sshll.u32 %s4252_s8, 4  ;;  %s2643_s9 = int_to_ptr.vmem [resolvable:$true] %s2642_s9 }
 0x3b1   : > { %3417 = vmatpush1.bf16.msra.mxu0 %v3884_v3  ;;  %3291 = vmatprep.subr.bf16.mxu1 %v3885_v16  ;;  %v2164_v3 = vsub.s32 1, %v5122_v25  ;;  %v2161_v16 = vrot.slane %v2156_v47, %v2160_v62  ;;  %p4160_p9 = scmp.lt.s32.totalorder %s2643_s9, %s2643_s9 }
 0x3b2   : > { %3419 = vmatprep.subr.bf16.mxu0 %v3888_v4 }
 0x3b3   : > { %v2165_v4 = vrot.slane %v2156_v47, %v2164_v3 }
 0x3b4   : > { %3293 = vmatpush1.bf16.msra.mxu1 %v3887_v5 }
 0x3b5   : > { %3421 = vmatpush1.bf16.msra.mxu0 %v3890_v6  ;;  %3295 = vmatprep.subr.bf16.mxu1 %v3891_v7 }
 0x3b6   : > { %3423 = vmatprep.subr.bf16.mxu0 %v3894_v8 }
 0x3b8   : > { %3297 = vmatpush1.bf16.msra.mxu1 %v3893_v13 }
 0x3b9   : > { %3425 = vmatpush1.bf16.msra.mxu0 %v3896_v12  ;;  %3299 = vmatprep.subr.bf16.mxu1 %v3897_v31 }
 0x3ba   : > { %3427 = vmatprep.subr.bf16.mxu0 %v3900_v15 }
 0x3bc   : > { %3301 = vmatpush1.bf16.msra.mxu1 %v3899_v10 }
 0x3bd   : > { %3429 = vmatpush1.bf16.msra.mxu0 %v3902_v2  ;;  %3303 = vmatprep.subr.bf16.mxu1 %v3903_v17 }
 0x3be   : > { %3431 = vmatprep.subr.bf16.mxu0 %v3906_v18  ;;  %v2498_v18 = vld [vmem:[#allocation15] sm:$0x3] }
 0x3c0   : > { %3305 = vmatpush1.bf16.msra.mxu1 %v3905_v20 }
 0x3c1   : > { %3433 = vmatpush1.bf16.msra.mxu0 %v3908_v29  ;;  %3307 = vmatprep.subr.bf16.mxu1 %v3909_v19 }
 0x3c2   : > { %3435 = vmatprep.subr.bf16.mxu0 %v3912_v22 }
 0x3c4   : > { %3309 = vmatpush1.bf16.msra.mxu1 %v3911_v24 }
 0x3c5   : > { %3437 = vmatpush1.bf16.msra.mxu0 %v3914_v23  ;;  %3311 = vmatprep.subr.bf16.mxu1 %v3915_v46 }
 0x3c6   : > { %3439 = vmatprep.subr.bf16.mxu0 %v3918_v26 }
 0x3c8   : > { %3313 = vmatpush1.bf16.msra.mxu1 %v3917_v27 }
 0x3c9   : > { %3441 = vmatpush1.bf16.msra.mxu0 %v3920_v43  ;;  %3315 = vmatprep.subr.bf16.mxu1 %v3921_v30 }
 0x3ca   : > { %3443 = vmatprep.subr.bf16.mxu0 %v3924_v34 }
 0x3cc   : > { %3317 = vmatpush1.bf16.msra.mxu1 %v3923_v35 }
 0x3cd   : > { %3445 = vmatpush1.bf16.msra.mxu0 %v3926_v59  ;;  %3319 = vmatprep.subr.bf16.mxu1 %v3927_v36 }
 0x3ce   : > { %3447 = vmatprep.subr.bf16.mxu0 %v3930_v37 }
 0x3d0   : > { %3321 = vmatpush1.bf16.msra.mxu1 %v3929_v38 }
 0x3d1   : > { %3449 = vmatpush1.bf16.msra.mxu0 %v3932_v39  ;;  %3323 = vmatprep.subr.bf16.mxu1 %v3933_v33 }
 0x3d2   : > { %3451 = vmatprep.subr.bf16.mxu0 %v3936_v0 }
 0x3d4   : > { %3325 = vmatpush1.bf16.msra.mxu1 %v3935_v1 }
 0x3d5   : > { %3453 = vmatpush1.bf16.msra.mxu0 %v3938_v21  ;;  %3327 = vmatprep.subr.bf16.mxu1 %v3939_v57 }
 0x3d6   : > { %3455 = vmatprep.subr.bf16.mxu0 %v3942_v40 }
 0x3d8   : > { %3329 = vmatpush1.bf16.msra.mxu1 %v3941_v14 }
 0x3d9   : > { %3457 = vmatpush1.bf16.msra.mxu0 %v3944_v41  ;;  %3331 = vmatprep.subr.bf16.mxu1 %v3945_v42 }
 0x3da   : > { %3459 = vmatprep.subr.bf16.mxu0 %v3948_v44 }
 0x3dc   : > { %3333 = vmatpush1.bf16.msra.mxu1 %v3947_v48 }
 0x3dd   : > { %3461 = vmatpush1.bf16.msra.mxu0 %v3950_v51  ;;  %3463 = vmatprep.subr.bf16.mxu1 %v2949_v45 }
 0x3df   : > { %2348 = vmatmul.mubr.f32.vlgmr.msra.gmra.mrb[0].mxu1 %v5152_v49  ;;  %v2953_v49 = vld [vmem:[%s4578_s18 + $0x60] sm:$0xff]  }
 0x3e0   : > { %2490 = vmatmul.mubr.f32.vlgmr.msra.gmra.mrb[0].mxu0 %v5154_v11  ;;  %3465 = vmatpush3.bf16.msra.mxu1 %v2879_v32  ;;  %v2945_v11 = vld [vmem:[%s4578_s18 + $0x20] sm:$0xff]   ;;  %s4153_s18 = scalar_lea.vmem %s2643_s9, 32 }
 0x3e1   : > { %3467 = vmatprep.subr.bf16.mxu1 %v2950_v52  ;;  %p4154_p11 = scmp.ne.s32.totalorder %s2643_s9, %s4153_s18  ;;  %p4161_p10 = scmp.lt.s32.totalorder %s4153_s18, %s4153_s18 }
 0x3e3   : > { %p4155_p4 = pnand %p4154_p11, %p3708_p1  ;;  %p4162_p5 = por %p4161_p10, %p4160_p9 }
 0x3e4   : > { %3469 = vmatpush3.bf16.msra.mxu1 %v2942_v53 }
 0x3e5   : > { %3471 = vmatprep.subr.bf16.mxu1 %v2951_v28  ;;  %p4156_p6 = pneg %p4155_p4 }
 0x3e7   : > { %p4163_p12 = pnand %p4162_p5, %p4156_p6 }
 0x3e8   : > { %3473 = vmatpush3.bf16.msra.mxu1 %v2943_v54 }
 0x3e9   : > { %3475 = vmatprep.subr.bf16.mxu1 %v2952_v55 }
 0x3ec   : > { %3477 = vmatpush3.bf16.msra.mxu1 %v2944_v9 }
 0x3ed   : > { %3479 = vmatprep.subr.bf16.mxu1 %v2953_v49 }
 0x3f0   : > { %3481 = vmatpush3.bf16.msra.mxu1 %v2945_v11 }
 0x3f1   : > { %3483 = vmatprep.subr.bf16.mxu1 %v2954_v63 }
 0x3f4   : > { %3485 = vmatpush3.bf16.msra.mxu1 %v2946_v50 }
 0x3f5   : > { %3487 = vmatprep.subr.bf16.mxu1 %v2955_v56 }
 0x3f8   : > { %3489 = vmatpush3.bf16.msra.mxu1 %v2947_v58 }
 0x3f9   : > { %3491 = vmatprep.subr.bf16.mxu1 %v2956_v60 }
 0x3fc   : > { %3493 = vmatpush3.bf16.msra.mxu1 %v2948_v61 }
 0x4b2   : > { %v2349_v5 = vpop.f32.mrb[0].mxu1 }
 0x4b3   : > { %v2491_v6 = vpop.f32.mrb[0].mxu0  ;;  %v3498_v7 = vadd.f32 %v2349_v5, %v2161_v16  ;;  %v2351_v8 = vpop.f32.mrb[1].mxu1 }
 0x4b4   : > { %v2493_v13 = vpop.f32.mrb[1].mxu0  ;;  %v3500_v12 = vadd.f32 %v2351_v8, %v2165_v4 }
 0x4b5   : > { %v3499_v31 = vadd.f32 %v3498_v7, %v2491_v6 }
 0x4b6   : > { %v3501_v15 = vadd.f32 %v3500_v12, %v2493_v13 }
 0x4b7   : > { %v2496_v2 = vmax.f32 %v3499_v31, 0.0 }
 0x4b8   : > { %v2497_v10 = vmax.f32 %v3501_v15, 0.0 }
 0x4ba   : > { %2627 = vmatprep.mubr.f32.mxu1 %v2497_v10 }
 0x4bb   : > { %2628 = vmatmul.mubr.f32.vlgmr.msra.gmra.mrb[2].mxu1 %v2496_v2 }
 0x58e   : > { %v3057_v17 = vpop.f32.mrb[2].mxu1 }
 0x58f   : > { %v3058_v20 = vpop.f32.mrb[3].mxu1 }
 0x590   : > { %v3059_v25 = vadd.f32 %v3058_v20, %v3057_v17 }
 0x592   : > { %v2633_v29 = vadd.f32 %v3059_v25, %v2498_v18 }
 0x594   : > { %2634 = vst [vmem:[#allocation15] sm:$0x3] %v2633_v29 }
 0x595   : > { %4166 = shalt.err (!%p4163_p12)
}
 0x596   : > { %s5343_s19 = sld [smem:[#allocation30_spill]] }
 0x59c   : > { %s4167_s22 = scalar_lea.hbm %s5343_s19, 32 }
 0x59d   : > { %p4168_p0 = scmp.ne.s32.totalorder %s5343_s19, %s4167_s22  ;;  %p4173_p7 = scmp.lt.u32.totalorder %s4167_s22, %s5343_s19 }
 0x59f   : > { %p4169_p3 = pnand %p4168_p0, %p3708_p1 }
 0x5a1   : > { %p4170_p8 = pneg %p4169_p3 }
 0x5a3   : > { %p4175_p13 = pnand %p4173_p7, %p4170_p8 }
 0x5a5   : > { %4178 = shalt.err (!%p4175_p13)
}
 0x5a6   : > { %3673 = dma.vmem_to_hbm [thread:$0]  (%p3708_p1), %s2643_s9, 32, %s5343_s19, [#allocation5]  }
 0x5a7   : > { %4216 = dma.done.wait (%p3708_p1), [#allocation5], 32  }
 0x5a8   : > { %4218 = vsyncadd (%p3708_p1), [#allocation5], 4294967264 }
 0x5a9 PF: > { %s5344_s12 = sld [smem:[#allocation23_spill]]  ;;  %s5345_s1 = sld [smem:[#allocation22_spill]] }
 0x5aa   : > { %s5346_s11 = sld [smem:[#allocation24_spill]]  ;;  %s5347_s30 = smov %s4225_s10 }
 0x5af   : > { %p25_p2 = scmp.ge.s32.totalorder %s5344_s12, 6   ;;  %s5348_s10 = smov %s5345_s1 }
 0x5b1   :  { %27 = sbr.rel (!%p25_p2) target bundleno = 15 (0xf), region = 138 }
 0x5b8   :  { %2655 = vsyncpa [#allocation4], 1 }
 0x5b9   :  { %2657 = vsyncpa [#allocation4 + $0x1], 1 }
 0x5ba   :  { %2658 = vsyncpa [#allocation7], 1 }
 0x5bb   :  { %2659 = vsyncpa [#allocation10], 1 }
 0x5bc   :  { %2661 = vsyncpa [#allocation10 + $0x1], 1 }
 0x5bd   :  { %2662 = vsyncpa [#allocation13], 1 }
 0x5be   :  { %2664 = vsyncpa [#allocation13 + $0x1], 1 }
 0x5bf   :  { %2665 = vsyncpa [#allocation5], 1 }
 0x5c0   :  { %2667 = vsyncpa [#allocation5 + $0x1], 1 }

</bundles_post_ra>
